<compile_context>
chip_gen: v7x
topology: tpu7x:2x2x1
jax: 0.10.0
libtpu: 0.0.40
codegen_flags: <defaults>
</compile_context>

<pallas_src>
from collections import defaultdict

import numpy as np
import jax
import jax.numpy as jnp
from jax import lax
from jax.experimental import pallas as pl
from jax.experimental.pallas import tpu as pltpu

# ----------------------------- problem geometry -----------------------------
CIN, COUT = 4, 8
H = W = 16
HP, WP = H + 2, W + 2          # zero-padded spatial (conv pad=1)
FLAT = HP * WP                 # 324: flattened padded image, row stride WP
FLAT_PAD = 384                 # lane-padded flat width (3 x 128)
CIN_PAD = 8                    # channels zero-padded to 8 -> clean MXU K dim
CONVW = H * WP                 # 288: working width of the flat conv activation
H2, W2 = H // 2, W // 2        # 8, 8 pooled spatial
DOUT = 10
DOUT_PAD = 128                 # lane-dense FC output width
KTAP = 3 * CIN_PAD             # 24: stacked conv contraction per kernel row
MAX_B_TILE = 32                # unroll / per-step slab cap


def _pick_b_tile(n):
    """Amortize per-step overhead, but keep >=2 grid steps (v7x megacore)."""
    if n <= 2:
        return 1
    bt = min(MAX_B_TILE, (n + 1) // 2)
    if bt >= 8:
        bt -= bt % 8           # multiple of 8 -> unmasked (8,128)-aligned stores
    return max(bt, 1)


# ------------------------------- fused kernel -------------------------------
def _fused_forward_kernel(x_ref, wt_ref, cb_ref, wfc_ref, fb_ref, o_ref,
                          pooled_scr):
    # x_ref      : (B_TILE, CIN_PAD, FLAT_PAD) f32  padded, flattened images
    # wt_ref     : (COUT, 9*CIN_PAD)           bf16 conv taps, col = (dh*3+dw)*8+ci
    # cb_ref     : (COUT, 1)                   f32  conv bias
    # wfc_ref    : (COUT, CONVW, DOUT_PAD)     bf16 per-channel scattered FC weight
    # fb_ref     : (1, DOUT_PAD)               f32  FC bias (zero-padded to 128)
    # o_ref      : (B_TILE, DOUT_PAD)          f32  logits, one row per element
    # pooled_scr : (COUT, B_TILE, CONVW)       f32  channel-major pooled staging
    bt = x_ref.shape[0]

    wt = wt_ref[...]                                               # (8, 72) bf16
    cb_full = jnp.broadcast_to(cb_ref[...], (COUT, CONVW))         # hoisted
    z1 = jnp.zeros((COUT, 1), jnp.float32)                         # hoisted shift tails
    zw = jnp.zeros((COUT, WP), jnp.float32)

    # ---- conv + bias + ReLU + 2x2 maxpool, one element at a time (registers) ----
    for b in range(bt):
        xb = x_ref[b]                                              # (8, 384) f32

        def conv_row(dh, xb=xb):
            # stack the 3 taps of kernel row dh along K: rows[dw*8+ci, p] = xb[ci, p+dh*WP+dw]
            rows = jnp.concatenate(
                [xb[:, dh * WP + dw: dh * WP + dw + CONVW] for dw in range(3)],
                axis=0)                                            # (24, 288) f32
            return jnp.dot(wt[:, dh * KTAP:(dh + 1) * KTAP],
                           rows.astype(jnp.bfloat16),
                           preferred_element_type=jnp.float32)     # (8, 288) f32

        acc = conv_row(0) + conv_row(1) + conv_row(2)
        # acc[co, WP*h + w] == conv(x)[co, h, w] for w < 16 (w in {16,17} is filler)
        y = jnp.maximum(acc + cb_full, 0.0)

        # MaxPool2d(2): max over lanes {p, p+1, p+WP, p+WP+1}; done as two
        # lane-shifted maxes on the register value (shift in zeros at the tail --
        # those lanes are invalid pooled positions whose FC weights are zero).
        m1 = jnp.maximum(y, jnp.concatenate([y[:, 1:], z1], axis=1))
        pooled = jnp.maximum(m1, jnp.concatenate([m1[:, WP:], zw], axis=1))

        pooled_scr[:, b, :] = pooled                               # channel-major stage

    # ---- Flatten + Linear(512->10): batch on M, per-channel weights ----
    acc_fc = jnp.dot(pooled_scr[0].astype(jnp.bfloat16), wfc_ref[0],
                     preferred_element_type=jnp.float32)           # (bt, 128)
    for co in range(1, COUT):
        acc_fc = acc_fc + jnp.dot(pooled_scr[co].astype(jnp.bfloat16),
                                  wfc_ref[co],
                                  preferred_element_type=jnp.float32)
    o_ref[...] = acc_fc + fb_ref[...]                              # lane-dense store


# --------------------------- host-side weight prep ---------------------------
def _prepare_weights(conv_w, conv_b, fc_w, fc_b):
    cw = np.asarray(conv_w, np.float32)                    # (COUT, CIN, 3, 3)
    # stacked conv taps: wt[co, (dh*3+dw)*8 + ci] = conv_w[co, ci, dh, dw]
    wt = np.zeros((COUT, 9 * CIN_PAD), np.float32)
    for dh in range(3):
        for dw in range(3):
            d = dh * 3 + dw
            wt[:, d * CIN_PAD:d * CIN_PAD + CIN] = cw[:, :, dh, dw]

    cb = np.asarray(conv_b, np.float32).reshape(COUT, 1)

    # Per-channel FC weight with MaxPool compaction + torch-Flatten (C,H,W) order
    # folded in: wfc[co, p, k] = fc_w[co*64 + h2*8 + w2, k] at p = 2*WP*h2 + 2*w2,
    # zero at every other (invalid / filler) position.
    fw = np.asarray(fc_w, np.float32)                      # (512, 10)
    wfc = np.zeros((COUT, CONVW, DOUT_PAD), np.float32)
    for h2 in range(H2):
        for w2 in range(W2):
            p = 2 * WP * h2 + 2 * w2
            wfc[:, p, :DOUT] = fw[np.arange(COUT) * (H2 * W2) + h2 * W2 + w2, :]

    fb = np.zeros((1, DOUT_PAD), np.float32)
    fb[0, :DOUT] = np.asarray(fc_b, np.float32)

    return (jnp.asarray(wt, dtype=jnp.bfloat16),
            jnp.asarray(cb, dtype=jnp.float32),
            jnp.asarray(wfc, dtype=jnp.bfloat16),
            jnp.asarray(fb, dtype=jnp.float32))


# ----------------------------- UserModel mirror ------------------------------
class UserModelJax:
    """Mirror of UserModel (blocks + edges).  The block DAG is the linear chain
    conv1 -> relu1 -> pool1 -> flatten1 -> fc1; it is static at trace time and is
    executed as ONE fused, batch-tiled Pallas kernel."""

    def __init__(self, params):
        # graph metadata kept for fidelity with UserModel's module_id_list/child_map
        self.module_id_list = ["conv1", "relu1", "pool1", "flatten1", "fc1"]
        self.child_map = defaultdict(list, {
            "conv1": ["relu1"], "relu1": ["pool1"],
            "pool1": ["flatten1"], "flatten1": ["fc1"],
        })
        self._wt, self._cb, self._wfc, self._fb = _prepare_weights(
            params["conv_w"], params["conv_b"], params["fc_w"], params["fc_b"])
        self._fwd = jax.jit(self._forward_impl)

    def _forward_impl(self, x):
        n = x.shape[0]
        bt = _pick_b_tile(n)
        steps = pl.cdiv(n, bt)
        n_pad = steps * bt

        # Input prep (fuses into a single XLA fusion): pad batch to n_pad, channels
        # 4->8, spatial 16x16 -> 18x18, flatten rows (stride WP=18), lane-pad to 384.
        xp = jnp.pad(x, ((0, n_pad - n), (0, CIN_PAD - CIN), (1, 1), (1, 1)))
        xflat = jnp.pad(xp.reshape(n_pad, CIN_PAD, FLAT),
                        ((0, 0), (0, 0), (0, FLAT_PAD - FLAT)))

        out = pl.pallas_call(
            _fused_forward_kernel,
            out_shape=jax.ShapeDtypeStruct((steps, bt, DOUT_PAD), jnp.float32),
            grid=(steps,),
            in_specs=[
                pl.BlockSpec((bt, CIN_PAD, FLAT_PAD), lambda i: (i, 0, 0)),
                # weights: constant block index -> fetched once, VMEM-resident
                # (small enough that double-buffering them is immaterial)
                pl.BlockSpec((COUT, 9 * CIN_PAD), lambda i: (0, 0)),
                pl.BlockSpec((COUT, 1), lambda i: (0, 0)),
                pl.BlockSpec((COUT, CONVW, DOUT_PAD), lambda i: (0, 0, 0)),
                pl.BlockSpec((1, DOUT_PAD), lambda i: (0, 0)),
            ],
            out_specs=pl.BlockSpec((None, bt, DOUT_PAD), lambda i: (i, 0, 0)),
            scratch_shapes=[pltpu.VMEM((COUT, bt, CONVW), jnp.float32)],
            compiler_params=pltpu.CompilerParams(
                dimension_semantics=("parallel",),
            ),
        )(xflat, self._wt, self._cb, self._wfc, self._fb)

        # one logits row per element; valid logits are lanes [0, DOUT)
        return out.reshape(n_pad, DOUT_PAD)[:n, :DOUT]

    def forward(self, x):
        return self._fwd(x)


# ------------------------------ pure-JAX reference ---------------------------
def reference_forward(x, conv_w, conv_b, fc_w, fc_b):
    y = lax.conv_general_dilated(x, conv_w, window_strides=(1, 1), padding="SAME",
                                 dimension_numbers=("NCHW", "OIHW", "NCHW"))
    y = jnp.maximum(y + conv_b.reshape(1, -1, 1, 1), 0.0)
    n = x.shape[0]
    y = y.reshape(n, COUT, H2, 2, W2, 2).max(axis=(3, 5))
    return y.reshape(n, -1) @ fc_w + fc_b


# ---------------------------------- main -------------------------------------
if __name__ == "__main__":
    key = jax.random.PRNGKey(0)
    k_x, k_cw, k_cb, k_fw, k_fb = jax.random.split(key, 5)

    hidden = COUT * H2 * W2      # 512
    params = {
        "conv_w": jax.random.normal(k_cw, (COUT, CIN, 3, 3), dtype=jnp.float32) * 0.1,
        "conv_b": jax.random.normal(k_cb, (COUT,), dtype=jnp.float32) * 0.1,
        "fc_w":   jax.random.normal(k_fw, (hidden, DOUT), dtype=jnp.float32) * 0.05,
        "fc_b":   jax.random.normal(k_fb, (DOUT,), dtype=jnp.float32) * 0.05,
    }
    model = UserModelJax(params)

    # N=2 matches the spec's small-shape example; N=13 exercises the batched path
    # (multi-element slab, batch padding, non-multiple-of-8 tile).
    for n in (2, 13):
        kx = jax.random.fold_in(k_x, n)
        x = jax.random.normal(kx, (n, CIN, H, W), dtype=jnp.float32)

        out = jax.block_until_ready(model.forward(x))
        assert out.shape == (n, DOUT), out.shape
        assert bool(jnp.all(jnp.isfinite(out)))

        # correctness vs. f32 reference (loose tolerance: bf16 MXU operands)
        ref = reference_forward(x, params["conv_w"], params["conv_b"],
                                params["fc_w"], params["fc_b"])
        max_err = float(jnp.max(jnp.abs(out - ref)))
        assert max_err < 0.1, f"n={n}: max abs err {max_err}"

    print("KERNEL_OK")
</pallas_src>

<mosaic_0001>
module attributes {stable_mosaic.version = 11 : i64} {
  func.func @_fused_forward_kernel(%arg0: i32, %arg1: memref<1x8x384xf32, #tpu.memory_space<vmem>>, %arg2: memref<8x72xbf16, #tpu.memory_space<vmem>>, %arg3: memref<8x1xf32, #tpu.memory_space<vmem>>, %arg4: memref<8x288x128xbf16, #tpu.memory_space<vmem>>, %arg5: memref<1x128xf32, #tpu.memory_space<vmem>>, %arg6: memref<1x1x128xf32, #tpu.memory_space<vmem>>, %arg7: memref<8x1x288xf32, #tpu.memory_space<vmem>>) attributes {dimension_semantics = [#tpu.dimension_semantics<parallel>], iteration_bounds = array<i64: 2>, scalar_prefetch = 0 : i64, scratch_operands = 1 : i64, tpu.core_type = #tpu.core_type<tc>, window_params = [{transform_indices = @transform_0, window_bounds = array<i64: 1, 8, 384>}, {pipeline_mode = #tpu.pipeline_mode<synchronous>, transform_indices = @transform_1, window_bounds = array<i64: 8, 72>}, {pipeline_mode = #tpu.pipeline_mode<synchronous>, transform_indices = @transform_2, window_bounds = array<i64: 8, 1>}, {pipeline_mode = #tpu.pipeline_mode<synchronous>, transform_indices = @transform_3, window_bounds = array<i64: 8, 288, 128>}, {pipeline_mode = #tpu.pipeline_mode<synchronous>, transform_indices = @transform_4, window_bounds = array<i64: 1, 128>}, {transform_indices = @transform_5, window_bounds = array<i64: 1, 1, 128>}]} {
    %c0 = arith.constant 0 : index
    %c0_0 = arith.constant 0 : index
    %0 = vector.load %arg2[%c0, %c0_0] : memref<8x72xbf16, #tpu.memory_space<vmem>>, vector<8x72xbf16>
    %c0_1 = arith.constant 0 : index
    %c0_2 = arith.constant 0 : index
    %1 = vector.load %arg3[%c0_1, %c0_2] : memref<8x1xf32, #tpu.memory_space<vmem>>, vector<8x1xf32>
    %2 = vector.shape_cast %1 : vector<8x1xf32> to vector<8x1xf32>
    %3 = vector.broadcast %2 : vector<8x1xf32> to vector<8x288xf32>
    %cst = arith.constant 0.000000e+00 : f32
    %4 = vector.broadcast %cst : f32 to vector<8x1xf32>
    %cst_3 = arith.constant 0.000000e+00 : f32
    %5 = vector.broadcast %cst_3 : f32 to vector<8x18xf32>
    %c0_4 = arith.constant 0 : index
    %c0_5 = arith.constant 0 : index
    %c0_6 = arith.constant 0 : index
    %6 = vector.load %arg1[%c0_4, %c0_5, %c0_6] : memref<1x8x384xf32, #tpu.memory_space<vmem>>, vector<1x8x384xf32>
    %7 = vector.shape_cast %6 : vector<1x8x384xf32> to vector<8x384xf32>
    %8 = vector.extract_strided_slice %7 {offsets = [0, 0], sizes = [8, 288], strides = [1, 1]} : vector<8x384xf32> to vector<8x288xf32>
    %9 = vector.extract_strided_slice %7 {offsets = [0, 1], sizes = [8, 288], strides = [1, 1]} : vector<8x384xf32> to vector<8x288xf32>
    %10 = vector.extract_strided_slice %7 {offsets = [0, 2], sizes = [8, 288], strides = [1, 1]} : vector<8x384xf32> to vector<8x288xf32>
    %11 = tpu.concatenate %8, %9, %10 in 0 : vector<8x288xf32>, vector<8x288xf32>, vector<8x288xf32> -> vector<24x288xf32>
    %12 = vector.extract_strided_slice %0 {offsets = [0, 0], sizes = [8, 24], strides = [1, 1]} : vector<8x72xbf16> to vector<8x24xbf16>
    %13 = arith.truncf %11 : vector<24x288xf32> to vector<24x288xbf16>
    %cst_7 = arith.constant dense<0.000000e+00> : vector<8x288xf32>
    %14 = tpu.matmul %12, %13, %cst_7 {dimension_numbers = #tpu.dot_dimension_numbers<[1], [0], [0], [1], [0, 0, 1, 1], [], []>} : vector<8x24xbf16>, vector<24x288xbf16>, vector<8x288xf32> -> vector<8x288xf32>
    %15 = vector.extract_strided_slice %7 {offsets = [0, 18], sizes = [8, 288], strides = [1, 1]} : vector<8x384xf32> to vector<8x288xf32>
    %16 = vector.extract_strided_slice %7 {offsets = [0, 19], sizes = [8, 288], strides = [1, 1]} : vector<8x384xf32> to vector<8x288xf32>
    %17 = vector.extract_strided_slice %7 {offsets = [0, 20], sizes = [8, 288], strides = [1, 1]} : vector<8x384xf32> to vector<8x288xf32>
    %18 = tpu.concatenate %15, %16, %17 in 0 : vector<8x288xf32>, vector<8x288xf32>, vector<8x288xf32> -> vector<24x288xf32>
    %19 = vector.extract_strided_slice %0 {offsets = [0, 24], sizes = [8, 24], strides = [1, 1]} : vector<8x72xbf16> to vector<8x24xbf16>
    %20 = arith.truncf %18 : vector<24x288xf32> to vector<24x288xbf16>
    %cst_8 = arith.constant dense<0.000000e+00> : vector<8x288xf32>
    %21 = tpu.matmul %19, %20, %cst_8 {dimension_numbers = #tpu.dot_dimension_numbers<[1], [0], [0], [1], [0, 0, 1, 1], [], []>} : vector<8x24xbf16>, vector<24x288xbf16>, vector<8x288xf32> -> vector<8x288xf32>
    %22 = arith.addf %14, %21 : vector<8x288xf32>
    %23 = vector.extract_strided_slice %7 {offsets = [0, 36], sizes = [8, 288], strides = [1, 1]} : vector<8x384xf32> to vector<8x288xf32>
    %24 = vector.extract_strided_slice %7 {offsets = [0, 37], sizes = [8, 288], strides = [1, 1]} : vector<8x384xf32> to vector<8x288xf32>
    %25 = vector.extract_strided_slice %7 {offsets = [0, 38], sizes = [8, 288], strides = [1, 1]} : vector<8x384xf32> to vector<8x288xf32>
    %26 = tpu.concatenate %23, %24, %25 in 0 : vector<8x288xf32>, vector<8x288xf32>, vector<8x288xf32> -> vector<24x288xf32>
    %27 = vector.extract_strided_slice %0 {offsets = [0, 48], sizes = [8, 24], strides = [1, 1]} : vector<8x72xbf16> to vector<8x24xbf16>
    %28 = arith.truncf %26 : vector<24x288xf32> to vector<24x288xbf16>
    %cst_9 = arith.constant dense<0.000000e+00> : vector<8x288xf32>
    %29 = tpu.matmul %27, %28, %cst_9 {dimension_numbers = #tpu.dot_dimension_numbers<[1], [0], [0], [1], [0, 0, 1, 1], [], []>} : vector<8x24xbf16>, vector<24x288xbf16>, vector<8x288xf32> -> vector<8x288xf32>
    %30 = arith.addf %22, %29 : vector<8x288xf32>
    %31 = arith.addf %30, %3 : vector<8x288xf32>
    %cst_10 = arith.constant 0.000000e+00 : f32
    %32 = vector.broadcast %cst_10 : f32 to vector<8x288xf32>
    %33 = arith.maximumf %31, %32 : vector<8x288xf32>
    %34 = vector.extract_strided_slice %33 {offsets = [0, 1], sizes = [8, 287], strides = [1, 1]} : vector<8x288xf32> to vector<8x287xf32>
    %35 = tpu.concatenate %34, %4 in 1 : vector<8x287xf32>, vector<8x1xf32> -> vector<8x288xf32>
    %36 = arith.maximumf %33, %35 : vector<8x288xf32>
    %37 = vector.extract_strided_slice %36 {offsets = [0, 18], sizes = [8, 270], strides = [1, 1]} : vector<8x288xf32> to vector<8x270xf32>
    %38 = tpu.concatenate %37, %5 in 1 : vector<8x270xf32>, vector<8x18xf32> -> vector<8x288xf32>
    %39 = arith.maximumf %36, %38 : vector<8x288xf32>
    %c0_11 = arith.constant 0 : index
    %c0_12 = arith.constant 0 : index
    %c0_13 = arith.constant 0 : index
    %40 = vector.load %arg7[%c0_11, %c0_12, %c0_13] : memref<8x1x288xf32, #tpu.memory_space<vmem>>, vector<8x1x288xf32>
    %41 = vector.shape_cast %40 : vector<8x1x288xf32> to vector<8x288xf32>
    %42 = vector.shape_cast %39 : vector<8x288xf32> to vector<8x1x288xf32>
    tpu.vector_store %arg7[%c0_11, %c0_12, %c0_13], %42 {strides = array<i32>} : memref<8x1x288xf32, #tpu.memory_space<vmem>>, vector<8x1x288xf32>,
    %c0_14 = arith.constant 0 : index
    %c0_15 = arith.constant 0 : index
    %c0_16 = arith.constant 0 : index
    %43 = vector.load %arg7[%c0_14, %c0_15, %c0_16] : memref<8x1x288xf32, #tpu.memory_space<vmem>>, vector<1x1x288xf32>
    %44 = vector.shape_cast %43 : vector<1x1x288xf32> to vector<1x288xf32>
    %45 = arith.truncf %44 : vector<1x288xf32> to vector<1x288xbf16>
    %c0_17 = arith.constant 0 : index
    %c0_18 = arith.constant 0 : index
    %c0_19 = arith.constant 0 : index
    %46 = vector.load %arg4[%c0_17, %c0_18, %c0_19] : memref<8x288x128xbf16, #tpu.memory_space<vmem>>, vector<1x288x128xbf16>
    %47 = vector.shape_cast %46 : vector<1x288x128xbf16> to vector<288x128xbf16>
    %cst_20 = arith.constant dense<0.000000e+00> : vector<1x128xf32>
    %48 = tpu.matmul %45, %47, %cst_20 {dimension_numbers = #tpu.dot_dimension_numbers<[1], [0], [0], [1], [0, 0, 1, 1], [], []>} : vector<1x288xbf16>, vector<288x128xbf16>, vector<1x128xf32> -> vector<1x128xf32>
    %c1 = arith.constant 1 : index
    %c0_21 = arith.constant 0 : index
    %c0_22 = arith.constant 0 : index
    %49 = vector.load %arg7[%c1, %c0_21, %c0_22] : memref<8x1x288xf32, #tpu.memory_space<vmem>>, vector<1x1x288xf32>
    %50 = vector.shape_cast %49 : vector<1x1x288xf32> to vector<1x288xf32>
    %51 = arith.truncf %50 : vector<1x288xf32> to vector<1x288xbf16>
    %c1_23 = arith.constant 1 : index
    %c0_24 = arith.constant 0 : index
    %c0_25 = arith.constant 0 : index
    %52 = vector.load %arg4[%c1_23, %c0_24, %c0_25] : memref<8x288x128xbf16, #tpu.memory_space<vmem>>, vector<1x288x128xbf16>
    %53 = vector.shape_cast %52 : vector<1x288x128xbf16> to vector<288x128xbf16>
    %cst_26 = arith.constant dense<0.000000e+00> : vector<1x128xf32>
    %54 = tpu.matmul %51, %53, %cst_26 {dimension_numbers = #tpu.dot_dimension_numbers<[1], [0], [0], [1], [0, 0, 1, 1], [], []>} : vector<1x288xbf16>, vector<288x128xbf16>, vector<1x128xf32> -> vector<1x128xf32>
    %55 = arith.addf %48, %54 : vector<1x128xf32>
    %c2 = arith.constant 2 : index
    %c0_27 = arith.constant 0 : index
    %c0_28 = arith.constant 0 : index
    %56 = vector.load %arg7[%c2, %c0_27, %c0_28] : memref<8x1x288xf32, #tpu.memory_space<vmem>>, vector<1x1x288xf32>
    %57 = vector.shape_cast %56 : vector<1x1x288xf32> to vector<1x288xf32>
    %58 = arith.truncf %57 : vector<1x288xf32> to vector<1x288xbf16>
    %c2_29 = arith.constant 2 : index
    %c0_30 = arith.constant 0 : index
    %c0_31 = arith.constant 0 : index
    %59 = vector.load %arg4[%c2_29, %c0_30, %c0_31] : memref<8x288x128xbf16, #tpu.memory_space<vmem>>, vector<1x288x128xbf16>
    %60 = vector.shape_cast %59 : vector<1x288x128xbf16> to vector<288x128xbf16>
    %cst_32 = arith.constant dense<0.000000e+00> : vector<1x128xf32>
    %61 = tpu.matmul %58, %60, %cst_32 {dimension_numbers = #tpu.dot_dimension_numbers<[1], [0], [0], [1], [0, 0, 1, 1], [], []>} : vector<1x288xbf16>, vector<288x128xbf16>, vector<1x128xf32> -> vector<1x128xf32>
    %62 = arith.addf %55, %61 : vector<1x128xf32>
    %c3 = arith.constant 3 : index
    %c0_33 = arith.constant 0 : index
    %c0_34 = arith.constant 0 : index
    %63 = vector.load %arg7[%c3, %c0_33, %c0_34] : memref<8x1x288xf32, #tpu.memory_space<vmem>>, vector<1x1x288xf32>
    %64 = vector.shape_cast %63 : vector<1x1x288xf32> to vector<1x288xf32>
    %65 = arith.truncf %64 : vector<1x288xf32> to vector<1x288xbf16>
    %c3_35 = arith.constant 3 : index
    %c0_36 = arith.constant 0 : index
    %c0_37 = arith.constant 0 : index
    %66 = vector.load %arg4[%c3_35, %c0_36, %c0_37] : memref<8x288x128xbf16, #tpu.memory_space<vmem>>, vector<1x288x128xbf16>
    %67 = vector.shape_cast %66 : vector<1x288x128xbf16> to vector<288x128xbf16>
    %cst_38 = arith.constant dense<0.000000e+00> : vector<1x128xf32>
    %68 = tpu.matmul %65, %67, %cst_38 {dimension_numbers = #tpu.dot_dimension_numbers<[1], [0], [0], [1], [0, 0, 1, 1], [], []>} : vector<1x288xbf16>, vector<288x128xbf16>, vector<1x128xf32> -> vector<1x128xf32>
    %69 = arith.addf %62, %68 : vector<1x128xf32>
    %c4 = arith.constant 4 : index
    %c0_39 = arith.constant 0 : index
    %c0_40 = arith.constant 0 : index
    %70 = vector.load %arg7[%c4, %c0_39, %c0_40] : memref<8x1x288xf32, #tpu.memory_space<vmem>>, vector<1x1x288xf32>
    %71 = vector.shape_cast %70 : vector<1x1x288xf32> to vector<1x288xf32>
    %72 = arith.truncf %71 : vector<1x288xf32> to vector<1x288xbf16>
    %c4_41 = arith.constant 4 : index
    %c0_42 = arith.constant 0 : index
    %c0_43 = arith.constant 0 : index
    %73 = vector.load %arg4[%c4_41, %c0_42, %c0_43] : memref<8x288x128xbf16, #tpu.memory_space<vmem>>, vector<1x288x128xbf16>
    %74 = vector.shape_cast %73 : vector<1x288x128xbf16> to vector<288x128xbf16>
    %cst_44 = arith.constant dense<0.000000e+00> : vector<1x128xf32>
    %75 = tpu.matmul %72, %74, %cst_44 {dimension_numbers = #tpu.dot_dimension_numbers<[1], [0], [0], [1], [0, 0, 1, 1], [], []>} : vector<1x288xbf16>, vector<288x128xbf16>, vector<1x128xf32> -> vector<1x128xf32>
    %76 = arith.addf %69, %75 : vector<1x128xf32>
    %c5 = arith.constant 5 : index
    %c0_45 = arith.constant 0 : index
    %c0_46 = arith.constant 0 : index
    %77 = vector.load %arg7[%c5, %c0_45, %c0_46] : memref<8x1x288xf32, #tpu.memory_space<vmem>>, vector<1x1x288xf32>
    %78 = vector.shape_cast %77 : vector<1x1x288xf32> to vector<1x288xf32>
    %79 = arith.truncf %78 : vector<1x288xf32> to vector<1x288xbf16>
    %c5_47 = arith.constant 5 : index
    %c0_48 = arith.constant 0 : index
    %c0_49 = arith.constant 0 : index
    %80 = vector.load %arg4[%c5_47, %c0_48, %c0_49] : memref<8x288x128xbf16, #tpu.memory_space<vmem>>, vector<1x288x128xbf16>
    %81 = vector.shape_cast %80 : vector<1x288x128xbf16> to vector<288x128xbf16>
    %cst_50 = arith.constant dense<0.000000e+00> : vector<1x128xf32>
    %82 = tpu.matmul %79, %81, %cst_50 {dimension_numbers = #tpu.dot_dimension_numbers<[1], [0], [0], [1], [0, 0, 1, 1], [], []>} : vector<1x288xbf16>, vector<288x128xbf16>, vector<1x128xf32> -> vector<1x128xf32>
    %83 = arith.addf %76, %82 : vector<1x128xf32>
    %c6 = arith.constant 6 : index
    %c0_51 = arith.constant 0 : index
    %c0_52 = arith.constant 0 : index
    %84 = vector.load %arg7[%c6, %c0_51, %c0_52] : memref<8x1x288xf32, #tpu.memory_space<vmem>>, vector<1x1x288xf32>
    %85 = vector.shape_cast %84 : vector<1x1x288xf32> to vector<1x288xf32>
    %86 = arith.truncf %85 : vector<1x288xf32> to vector<1x288xbf16>
    %c6_53 = arith.constant 6 : index
    %c0_54 = arith.constant 0 : index
    %c0_55 = arith.constant 0 : index
    %87 = vector.load %arg4[%c6_53, %c0_54, %c0_55] : memref<8x288x128xbf16, #tpu.memory_space<vmem>>, vector<1x288x128xbf16>
    %88 = vector.shape_cast %87 : vector<1x288x128xbf16> to vector<288x128xbf16>
    %cst_56 = arith.constant dense<0.000000e+00> : vector<1x128xf32>
    %89 = tpu.matmul %86, %88, %cst_56 {dimension_numbers = #tpu.dot_dimension_numbers<[1], [0], [0], [1], [0, 0, 1, 1], [], []>} : vector<1x288xbf16>, vector<288x128xbf16>, vector<1x128xf32> -> vector<1x128xf32>
    %90 = arith.addf %83, %89 : vector<1x128xf32>
    %c7 = arith.constant 7 : index
    %c0_57 = arith.constant 0 : index
    %c0_58 = arith.constant 0 : index
    %91 = vector.load %arg7[%c7, %c0_57, %c0_58] : memref<8x1x288xf32, #tpu.memory_space<vmem>>, vector<1x1x288xf32>
    %92 = vector.shape_cast %91 : vector<1x1x288xf32> to vector<1x288xf32>
    %93 = arith.truncf %92 : vector<1x288xf32> to vector<1x288xbf16>
    %c7_59 = arith.constant 7 : index
    %c0_60 = arith.constant 0 : index
    %c0_61 = arith.constant 0 : index
    %94 = vector.load %arg4[%c7_59, %c0_60, %c0_61] : memref<8x288x128xbf16, #tpu.memory_space<vmem>>, vector<1x288x128xbf16>
    %95 = vector.shape_cast %94 : vector<1x288x128xbf16> to vector<288x128xbf16>
    %cst_62 = arith.constant dense<0.000000e+00> : vector<1x128xf32>
    %96 = tpu.matmul %93, %95, %cst_62 {dimension_numbers = #tpu.dot_dimension_numbers<[1], [0], [0], [1], [0, 0, 1, 1], [], []>} : vector<1x288xbf16>, vector<288x128xbf16>, vector<1x128xf32> -> vector<1x128xf32>
    %97 = arith.addf %90, %96 : vector<1x128xf32>
    %c0_63 = arith.constant 0 : index
    %c0_64 = arith.constant 0 : index
    %98 = vector.load %arg5[%c0_63, %c0_64] : memref<1x128xf32, #tpu.memory_space<vmem>>, vector<1x128xf32>
    %99 = arith.addf %97, %98 : vector<1x128xf32>
    %c0_65 = arith.constant 0 : index
    %c0_66 = arith.constant 0 : index
    %c0_67 = arith.constant 0 : index
    %100 = vector.load %arg6[%c0_65, %c0_66, %c0_67] : memref<1x1x128xf32, #tpu.memory_space<vmem>>, vector<1x1x128xf32>
    %101 = vector.shape_cast %100 : vector<1x1x128xf32> to vector<1x128xf32>
    %102 = vector.shape_cast %99 : vector<1x128xf32> to vector<1x1x128xf32>
    tpu.vector_store %arg6[%c0_65, %c0_66, %c0_67], %102 {strides = array<i32>} : memref<1x1x128xf32, #tpu.memory_space<vmem>>, vector<1x1x128xf32>,
    return
  }
  func.func @transform_0(%arg0: i32) -> (i32, i32, i32) {
    %c0_i32 = arith.constant 0 : i32
    %c0_i32_0 = arith.constant 0 : i32
    %c0_i32_1 = arith.constant 0 : i32
    return %arg0, %c0_i32, %c0_i32_0 : i32, i32, i32
  }
  func.func @transform_1(%arg0: i32) -> (i32, i32) {
    %c0_i32 = arith.constant 0 : i32
    %c0_i32_0 = arith.constant 0 : i32
    %c0_i32_1 = arith.constant 0 : i32
    return %c0_i32, %c0_i32_0 : i32, i32
  }
  func.func @transform_2(%arg0: i32) -> (i32, i32) {
    %c0_i32 = arith.constant 0 : i32
    %c0_i32_0 = arith.constant 0 : i32
    %c0_i32_1 = arith.constant 0 : i32
    return %c0_i32, %c0_i32_0 : i32, i32
  }
  func.func @transform_3(%arg0: i32) -> (i32, i32, i32) {
    %c0_i32 = arith.constant 0 : i32
    %c0_i32_0 = arith.constant 0 : i32
    %c0_i32_1 = arith.constant 0 : i32
    %c0_i32_2 = arith.constant 0 : i32
    return %c0_i32, %c0_i32_0, %c0_i32_1 : i32, i32, i32
  }
  func.func @transform_4(%arg0: i32) -> (i32, i32) {
    %c0_i32 = arith.constant 0 : i32
    %c0_i32_0 = arith.constant 0 : i32
    %c0_i32_1 = arith.constant 0 : i32
    return %c0_i32, %c0_i32_0 : i32, i32
  }
  func.func @transform_5(%arg0: i32) -> (i32, i32, i32) {
    %c0_i32 = arith.constant 0 : i32
    %c0_i32_0 = arith.constant 0 : i32
    %c0_i32_1 = arith.constant 0 : i32
    return %arg0, %c0_i32, %c0_i32_0 : i32, i32, i32
  }
}

</mosaic_0001>

<bundles_post_ra>
// kernel: _forward_impl.1
= control target key start
LH: loop header
LB: loop body
LE: loop exit
PB: predicated region body
PF: predicated region fallthrough
CT: control target
= control target key end

     0   :  { %10 = vsyncpa [#allocation4], 0  ;;  %s4002_s0 = inlined_call_operand.vmem [shape: f32[2,8,384], index: 0, kind: input, shape index: {}]   ;;  %s4003_s1 = inlined_call_operand.vmem [shape: bf16[8,72], index: 1, kind: input, shape index: {}]   ;;  %s4004_s2 = inlined_call_operand.vmem [shape: f32[8,1], index: 2, kind: input, shape index: {}]   ;;  %s4005_s3 = inlined_call_operand.hbm [shape: bf16[8,288,128], index: 3, kind: input, shape index: {}]   ;;  %s4006_s4 = inlined_call_operand.vmem [shape: f32[1,128], index: 4, kind: input, shape index: {}]   ;;  %s4007_s5 = inlined_call_operand.hbm [shape: f32[2,1,128], index: 5, kind: output, shape index: {}]  }
   0x1   :  { %11 = vsyncpa [#allocation5], 0 }
   0x2   :  { %13 = vsyncpa [#allocation5 + $0x1], 0  ;;  %s3661_s18 = smov 0   ;;  %s3663_s19 = smov 0  }
   0x3   :  { %s3665_s20 = smov 0   ;;  %s3667_s21 = smov 0  }
   0x4 LB: > { %s3682_s22 = sadd.s32 4294967295, %s3615_s21   ;;  %s2833_s23 = sadd.s32 4294967294, %s3615_s21   ;;  %s3615_s21 = sphi %s3667_s21, %s4025_s21   ;;  %s3611_s20 = sphi %s3665_s20, %s4024_s20   ;;  %s3607_s19 = sphi %s3663_s19, %s4023_s19   ;;  %s3603_s18 = sphi %s3661_s18, %s4022_s18  }
   0x5   : > { %s3686_s24 = sadd.s32 1, %s3615_s21   ;;  %s136_s25 = sadd.s32 1, %s3611_s20 }
   0x6   : > { %s133_s26 = ssub.s32 %s3615_s21, %s3686_s24  ;;  %p146_p0 = scmp.ne.s32.totalorder %s3611_s20, %s3607_s19 }
   0x7   : > { %p134_p1 = scmp.eq.s32.totalorder %s133_s26, 0  ;;  %p147_p2 = scmp.eq.s32.totalorder %s3682_s22, 1 }
   0x8   : > { %p152_p3 = scmp.ne.s32.totalorder %s3607_s19, %s3603_s18  ;;  %p153_p4 = scmp.eq.s32.totalorder %s2833_s23, 1 }
   0x9   : > { %s3697_s27 = scalar_select %p134_p1, %s3611_s20, %s136_s25  }
   0xa   : > { %p3699_p5 = por %p147_p2, %p146_p0  ;;  %p3703_p6 = por %p153_p4, %p152_p3 }
   0xb   : > { %p2834_p7 = scmp.ge.s32.totalorder %s3615_s21, 1  ;;  %p160_p8 = scmp.lt.s32.totalorder %s3615_s21, 3 }
   0xc   : > { %s4011_s28 = scalar_select %p3699_p5, 1, 0 }
   0xd   : > { %s4012_s29 = scalar_select %p3703_p6, 1, 0 }
   0xe   : > { %p4008_p9 = scmp.eq.s32.totalorder %s3682_s22, 0  ;;  %p3710_p10 = pnand %p2834_p7, %p160_p8 }
   0xf   : > { %s3617_s6 = smov [#allocation3]   ;;  %s3521_s11 = scalar_lea.hbm %s4005_s3, 18432 }
  0x10   : > { %s4013_s30 = scalar_select %p3710_p10, 1, 0 }
  0x11   : > { %s178_s7 = sshll.u32 %s3617_s6, 4  ;;  %p3309_p11 = pneg %p3710_p10  ;;  %s179_s7 = int_to_ptr.vmem [resolvable:$true] %s178_s7 }
  0x12   : > { %p3522_p13 = scmp.ne.s32.totalorder %s4005_s3, %s3521_s11  ;;  %p3528_p3 = scmp.lt.u32.totalorder %s3521_s11, %s4005_s3 }
  0x13   : > { %p3718_p12 = pnand %p4008_p9, %p3309_p11 }
  0x15   : > { %p3523_p0 = pneg %p3718_p12 }
  0x17   : > { %p3524_p1 = pnand %p3523_p0, %p3522_p13 }
  0x19   : > { %p3525_p2 = pneg %p3524_p1 }
  0x1b   : > { %p3530_p4 = pnand %p3528_p3, %p3525_p2 }
  0x1d   : > { %3533 = shalt.err (!%p3530_p4)
}
  0x1e   : > { %s3534_s16 = scalar_lea.vmem %s179_s7, 18432  ;;  %p3542_p9 = scmp.lt.s32.totalorder %s179_s7, %s179_s7 }
  0x1f   : > { %p3535_p7 = scmp.ne.s32.totalorder %s179_s7, %s3534_s16  ;;  %p3543_p6 = scmp.lt.s32.totalorder %s3534_s16, %s3534_s16 }
  0x21   : > { %p3537_p8 = pnand %p3535_p7, %p3523_p0  ;;  %p3544_p5 = por %p3543_p6, %p3542_p9 }
  0x23   : > { %p3538_p11 = pneg %p3537_p8 }
  0x25   : > { %p3545_p10 = pnand %p3544_p5, %p3538_p11 }
  0x27   : > { %3548 = shalt.err (!%p3545_p10)
}
  0x28   : > { %s3618_s17 = smov 64   ;;  %s3619_s23 = smov 4  }
  0x29   : > { %3312 = dma.hbm_to_vmem [thread:$0]  (!%p3718_p12), %s4005_s3, 18432, %s179_s7, [#allocation4], %s3618_s17, %s3618_s17, %s3619_s23  }
  0x2a   : > { %p4015_p13 = scmp.ne.s32.totalorder %s4013_s30, 0 }
  0x2b   : > { %p4016_p1 = scmp.eq.s32.totalorder (!%p4015_p13), %s3682_s22, 0 }
  0x2c   : > { %205 = sbr.rel (%p4015_p13) target bundleno = 1196 (0x4ac), region = 40 }
  0x33   : > { %3594 = dma.done.wait (%p4016_p1), [#allocation4], 18432   ;;  %p4017_p0 = pmov %p4016_p1 }
  0x34   : > { %p232_p5 = scmp.lt.s32.totalorder %s3682_s22, 1  ;;  %s3620_s30 = smov 127   ;;  %v3622_v5 = vmov 0.0   ;;  %vm257_vm0 = vcmask 1039360   ;;  %vm269_vm1 = vcmask 1031168   ;;  %vm3623_vm2 = vmmov 0  }
  0x35   : > { %3596 = vsyncadd (%p4017_p0), [#allocation4], 4294948864  ;;  %s3621_s7 = smov 126   ;;  %3214 = vmatprep.subr.bf16.mxu1 %v3622_v5  ;;  %3218 = vmatprep.mubr.msk.bf16.mxu1 %vm3623_vm2, %v3622_v5  ;;  %s3624_s12 = smov 110   ;;  %v3625_v19 = vmov 0   ;;  %v239_v27 = vld [vmem:[%s4004_s2] sm:$0xff] }
  0x36   : > { %s233_s6 = scalar_select %p232_p5, %s3682_s22, 1  ;;  %358 = vmatprep.mubr.bf16.mxu0 %v3625_v19  ;;  %3375 = vset.pattern.permute.xlu0 %v3625_v19  ;;  %v3773_v24 = vld [vmem:[%s4003_s1] sm:$0xf]  ;;  %vm304_vm3 = vcmask 900096   ;;  %vm316_vm4 = vcmask 1043456   ;;  %vm312_vm5 = vcmask 195584  }
  0x37   : > { %v2840_v26 = vcombine.low %v3773_v24, %v3773_v24  ;;  %s3626_s15 = smov 92   ;;  %s3627_s16 = smov 104   ;;  %vm514_vm6 = vcmask 752640   ;;  %vm638_vm7 = vcmask 252928   ;;  %vm658_vm8 = vcmask 113664  }
  0x38   : > { %s3302_s9 = smul.u32 24, %s233_s6  ;;  %s3628_s17 = smov 80   ;;  %vm975_vm10 = vcmask 261120  }
  0x39   : > { %s230_s26 = sand.u32 1, %s3607_s19   ;;  %s3002_s10 = sshll.u32 %s3682_s22, 4 }
  0x3a   : > { %s236_s11 = scalar_lea.vmem %s4002_s0, %s3302_s9  ;;  %s231_s8 = scalar_lea.vmem [#allocation6], %s230_s26 }
  0x3b   : > { %v246_v0 = vld [vmem:[%s236_s11 + $0x8] sm:$0xff]  ;;  %v247_v1 = vld [vmem:[%s236_s11 + $0x10] sm:$0xff]  ;;  %v245_v2 = vld [vmem:[%s236_s11] sm:$0xff]  ;;  %s2766_s11 = sshll.u32 %s231_s8, 4  ;;  %s2754_s13 = scalar_lea.sflag [#allocation5], %s230_s26  ;;  %s3962_s11 = int_to_ptr.vmem [resolvable:$true] %s2766_s11 }
  0x3c   : > { %v3365_v3 = vpack.i.bf16 %v247_v1, %v246_v0  ;;  %v3370_v4 = vpack.i.bf16 %v246_v0, %v245_v2  ;;  %s3549_s14 = scalar_lea.vmem %s3962_s11, 16  ;;  %p4020_p9 = scmp.ne.s32.totalorder %s4011_s28, 0 }
  0x3d   : > { %p3550_p6 = scmp.ne.s32.totalorder %s3962_s11, %s3549_s14  ;;  %s3630_s22 = smov [#allocation6]  }
  0x3e   : > { %3366 = vrot.lane.b32.xlu0 %v3365_v3, %s3620_s30  ;;  %3371 = vrot.lane.b32.xlu1 %v3370_v4, %s3621_s7 }
  0x3f   : > { %p3551_p10 = pnand %p3550_p6, %p4020_p9 }
  0x41   : > { %p3552_p12 = pneg %p3551_p10 }
  0x42   : > { %251 = vrot.lane.b32.xlu0 %v245_v2, %s3620_s30  ;;  %267 = vrot.lane.b32.xlu1 %v247_v1, %s3621_s7 }
  0xb0   : > { %v3367_v6 = vpop.permute.xlu0 %3366  ;;  %v3372_v7 = vpop.permute.xlu1 %3371 }
  0xb1   : > { %v3369_v8 = vunpack.i.h.bf16 %v3367_v6  ;;  %v3368_v9 = vunpack.i.l.bf16 %v3367_v6  ;;  %v3374_v10 = vunpack.i.h.bf16 %v3372_v7  ;;  %v3373_v11 = vunpack.i.l.bf16 %v3372_v7 }
  0xb3   : > { %v3752_v12 = vpack.c.bf16 %v3369_v8, %v247_v1  ;;  %v259_v13 = vsel %vm257_vm0, %v3368_v9, %v3369_v8  ;;  %v270_v14 = vsel %vm269_vm1, %v3373_v11, %v3374_v10 }
  0xb4   : > { %v252_v15 = vpop.permute.xlu0 %251  ;;  %v276_v16 = vpack.c.bf16 %v259_v13, %v246_v0  ;;  %v3761_v18 = vpack.c.bf16 %v270_v14, %v270_v14  ;;  %v268_v20 = vpop.permute.xlu1 %267 }
  0xb5   : > { %v258_v17 = vsel %vm257_vm0, %v252_v15, %v3368_v9  ;;  %296 = vrot.lane.b32.xlu1 %v3752_v12, %s3624_s12  ;;  %v271_v22 = vsel %vm269_vm1, %v3374_v10, %v268_v20  ;;  %v280_v23 = vpack.c.bf16 %v268_v20, %v268_v20 }
  0xb6   : > { %294 = vrot.lane.b32.xlu0 %v276_v16, %s3624_s12  ;;  %v275_v21 = vpack.c.bf16 %v258_v17, %v245_v2  ;;  %v279_v25 = vpack.c.bf16 %v271_v22, %v271_v22  ;;  %v411_v45 = vsel %vm316_vm4, %v3761_v18, 0 }
  0xb7   : > { %v417_v44 = vsel %vm316_vm4, %v280_v23, 0 }
  0xb9   : > { %298 = vrot.lane.b32.xlu1 %v3761_v18, %s3624_s12 }
  0xba   : > { %292 = vrot.lane.b32.xlu0 %v275_v21, %s3624_s12 }
  0xbd   : > { %302 = vrot.lane.b32.xlu1 %v280_v23, %s3624_s12 }
  0xbe   : > { %300 = vrot.lane.b32.xlu0 %v279_v25, %s3624_s12 }
  0xc1   : > { %504 = vrot.lane.b32.xlu1 %v276_v16, %s3626_s15 }
  0xc2   : > { %284 = vrot.lane.b32.xlu0 %v2840_v26, %s3627_s16 }
  0xc5   : > { %502 = vrot.lane.b32.xlu1 %v275_v21, %s3626_s15 }
  0xc6   : > { %506 = vrot.lane.b32.xlu0 %v3752_v12, %s3626_s15 }
  0xc9   : > { %510 = vrot.lane.b32.xlu1 %v279_v25, %s3626_s15 }
  0xca   : > { %508 = vrot.lane.b32.xlu0 %v3761_v18, %s3626_s15 }
  0xcd   : > { %500 = vrot.lane.b32.xlu1 %v2840_v26, %s3628_s17 }
  0xce   : > { %512 = vrot.lane.b32.xlu0 %v280_v23, %s3626_s15  ;;  %s3553_s15 = sshll.u32 %s3630_s22, 4  ;;  %s3554_s15 = int_to_ptr.vmem [resolvable:$false] %s3553_s15 }
  0xcf   : > { %s3555_s16 = scalar_lea.vmem %s3554_s15, 32  ;;  %p3556_p2 = scmp.lt.s32.totalorder %s3962_s11, %s3554_s15 }
  0xd0   : > { %p3557_p3 = scmp.lt.s32.totalorder %s3555_s16, %s3549_s14 }
  0xd2   : > { %242 = vperm.xlu0 %3375, %v239_v27   ;;  %p3558_p4 = por %p3557_p3, %p3556_p2 }
  0xd4   : > { %p3559_p7 = pnand %p3558_p4, %p3552_p12 }
 0x127   : > { %v297_v28 = vpop.permute.xlu1 %296 }
 0x128   : > { %3215 = vmatpush3.bf16.msra.mxu1 %v297_v28  ;;  %v295_v29 = vpop.permute.xlu0 %294 }
 0x129   : > { %v306_v30 = vsel %vm304_vm3, %v295_v29, %v297_v28  ;;  %3216 = vmatprep.subr.bf16.mxu1 %v3622_v5 }
 0x12a   : > { %326 = vmatprep.subr.bf16.mxu0 %v306_v30  ;;  %v3378_v30 = vld [vmem:[#allocation3 + $0x90] sm:$0xff]  }
 0x12b   : > { %v299_v31 = vpop.permute.xlu1 %298 }
 0x12c   : > { %v293_v32 = vpop.permute.xlu0 %292 }
 0x12d   : > { %v305_v33 = vsel %vm304_vm3, %v293_v32, %v295_v29  ;;  %v3377_v29 = vld [vmem:[#allocation3 + $0xd0] sm:$0xff]  }
 0x12e   : > { %327 = vmatpush1.bf16.msra.mxu0 %v305_v33  ;;  %v3380_v33 = vld [vmem:[#allocation3 + $0x98] sm:$0xff]  }
 0x12f   : > { %v303_v34 = vpop.permute.xlu1 %302 }
 0x130   : > { %v301_v35 = vpop.permute.xlu0 %300  ;;  %v324_v36 = vsel %vm316_vm4, %v303_v34, 0 }
 0x131   : > { %v307_v37 = vsel %vm304_vm3, %v299_v31, %v301_v35  ;;  %v308_v38 = vsel %vm304_vm3, %v301_v35, %v303_v34  ;;  %3217 = vmatpush3.bf16.msra.mxu1 %v324_v36  ;;  %v3379_v31 = vld [vmem:[#allocation3 + $0xd8] sm:$0xff]   ;;  %v3381_v34 = vld [vmem:[#allocation3 + $0xe0] sm:$0xff]  }
 0x132   : > { %2841 = vmatprep.subr.msk.bf16.mxu0 %vm316_vm4, %v308_v38  ;;  %v318_v39 = vsel %vm316_vm4, %v307_v37, 0  ;;  %3222 = vmatprep.subr.bf16.mxu1 %v3622_v5  ;;  %v3382_v35 = vld [vmem:[#allocation3 + $0xa0] sm:$0xff]   ;;  %v3383_v37 = vld [vmem:[#allocation3 + $0xe8] sm:$0xff]  }
 0x133   : > { %v505_v40 = vpop.permute.xlu1 %504  ;;  %329 = vmatpush1.bf16.msra.mxu0 %v318_v39  ;;  %v3384_v38 = vld [vmem:[#allocation3 + $0xa8] sm:$0xff]  }
 0x134   : > { %419 = vmatprep.subr.bf16.mxu0 %v276_v16  ;;  %v285_v41 = vpop.permute.xlu0 %284 }
 0x135   : > { %3219 = vmatmul.mubr.msk.bf16.vlgmr.msra.gmra.mrb[0].mxu1 %vm312_vm5, %v285_v41 }
 0x136   : > { %3223 = vmatpush3.bf16.msra.mxu1 %v3752_v12  ;;  %2842 = vmatmul.mubr.msk.bf16.vlgmr.msra.gmra.mrb[0].mxu0 %vm312_vm5, %v285_v41 }
 0x137   : > { %v503_v42 = vpop.permute.xlu1 %502  ;;  %420 = vmatpush1.bf16.msra.mxu0 %v275_v21  ;;  %3224 = vmatprep.subr.bf16.mxu1 %v3622_v5 }
 0x138   : > { %2844 = vmatprep.subr.msk.bf16.mxu0 %vm316_vm4, %v279_v25  ;;  %v507_v43 = vpop.permute.xlu0 %506  ;;  %3226 = vmatprep.mubr.msk.bf16.mxu1 %vm3623_vm2, %v3622_v5  ;;  %v515_v49 = vsel %vm514_vm6, %v503_v42, %v505_v40 }
 0x139   : > { %451 = vmatprep.mubr.bf16.mxu0 %v3625_v19  ;;  %v516_v46 = vsel %vm514_vm6, %v505_v40, %v507_v43 }
 0x13a   : > { %3225 = vmatpush3.bf16.msra.mxu1 %v417_v44 }
 0x13b   : > { %422 = vmatpush1.bf16.msra.mxu0 %v411_v45  ;;  %3230 = vmatprep.subr.bf16.mxu1 %v3622_v5  ;;  %v511_v47 = vpop.permute.xlu1 %510 }
 0x13c   : > { %534 = vmatprep.subr.bf16.mxu0 %v516_v46  ;;  %v509_v48 = vpop.permute.xlu0 %508  ;;  %v3386_v46 = vld [vmem:[#allocation3 + $0xb0] sm:$0xff]  }
 0x13d   : > { %3227 = vmatmul.mubr.msk.bf16.vlgmr.msra.gmra.mrb[4].mxu1 %vm312_vm5, %v3773_v24  ;;  %v517_v50 = vsel %vm514_vm6, %v509_v48, %v511_v47  ;;  %v3387_v48 = vld [vmem:[#allocation3 + $0xf8] sm:$0xff]  }
 0x13e   : > { %3231 = vmatpush3.bf16.msra.mxu1 %v507_v43  ;;  %2845 = vmatmul.mubr.msk.bf16.vlgmr.msra.gmra.mrb[4].mxu0 %vm312_vm5, %v3773_v24  ;;  %v526_v54 = vsel %vm316_vm4, %v517_v50, 0  ;;  %v3385_v43 = vld [vmem:[#allocation3 + $0xf0] sm:$0xff]   ;;  %v3388_v50 = vld [vmem:[#allocation3 + $0xb8] sm:$0xff]  }
 0x13f   : > { %535 = vmatpush1.bf16.msra.mxu0 %v515_v49  ;;  %3232 = vmatprep.subr.bf16.mxu1 %v3622_v5  ;;  %v501_v55 = vpop.permute.xlu1 %500 }
 0x140   : > { %v513_v51 = vpop.permute.xlu0 %512  ;;  %3234 = vmatprep.mubr.msk.bf16.mxu1 %vm3623_vm2, %v3622_v5  ;;  %566 = vmatprep.mubr.bf16.mxu0 %v3625_v19 }
 0x141   : > { %v518_v52 = vsel %vm514_vm6, %v511_v47, %v513_v51  ;;  %v532_v53 = vsel %vm316_vm4, %v513_v51, 0  ;;  %v3389_v51 = vld [vmem:[#allocation3 + $0x100] sm:$0xff]  }
 0x142   : > { %2847 = vmatprep.subr.msk.bf16.mxu0 %vm316_vm4, %v518_v52  ;;  %3233 = vmatpush3.bf16.msra.mxu1 %v532_v53  ;;  %v3390_v52 = vld [vmem:[#allocation3 + $0x110] sm:$0xff]   ;;  %v3391_v53 = vld [vmem:[#allocation3 + $0xc0] sm:$0xff]  }
 0x143   : > { %537 = vmatpush1.bf16.msra.mxu0 %v526_v54  ;;  %3238 = vmatprep.subr.bf16.mxu1 %v3622_v5  ;;  %v3392_v54 = vld [vmem:[#allocation3 + $0x108] sm:$0xff]  }
 0x144   : > { %3014 = vmatprep.subr.bf16.mxu0 %v3377_v29 }
 0x145   : > { %3235 = vmatmul.mubr.msk.bf16.vlgmr.msra.gmra.mrb[8].mxu1 %vm312_vm5, %v501_v55 }
 0x146   : > { %2848 = vmatmul.mubr.msk.bf16.vlgmr.msra.gmra.mrb[8].mxu0 %vm312_vm5, %v501_v55  ;;  %3242 = vmatprep.mubr.msk.bf16.mxu1 %vm3623_vm2, %v3622_v5  ;;  %v3393_v55 = vld [vmem:[#allocation3 + $0x118] sm:$0xff]  }
 0x147   : > { %3015 = vmatpush3.bf16.msra.mxu0 %v3378_v30  ;;  %3239 = vmatpush3.bf16.msra.mxu1 %v3390_v52 }
 0x148   : > { %3016 = vmatprep.subr.bf16.mxu0 %v3379_v31  ;;  %3240 = vmatprep.subr.bf16.mxu1 %v3622_v5 }
 0x14b   : > { %3017 = vmatpush3.bf16.msra.mxu0 %v3380_v33  ;;  %3241 = vmatpush3.bf16.msra.mxu1 %v3393_v55 }
 0x14c   : > { %3018 = vmatprep.subr.bf16.mxu0 %v3381_v34 }
 0x14f   : > { %3019 = vmatpush3.bf16.msra.mxu0 %v3382_v35 }
 0x150   : > { %3020 = vmatprep.subr.bf16.mxu0 %v3383_v37 }
 0x151   : > { %v243_v13 = vpop.permute.xlu0 %242 }
 0x153   : > { %3021 = vmatpush3.bf16.msra.mxu0 %v3384_v38 }
 0x154   : > { %3022 = vmatprep.subr.bf16.mxu0 %v3385_v43 }
 0x157   : > { %3023 = vmatpush3.bf16.msra.mxu0 %v3386_v46  ;;  %v3399_v46 = vld [vmem:[#allocation3 + $0x8] sm:$0xff]  }
 0x158   : > { %3024 = vmatprep.subr.bf16.mxu0 %v3387_v48  ;;  %v3400_v48 = vld [vmem:[#allocation3 + $0x88] sm:$0xff]  }
 0x15b   : > { %3025 = vmatpush3.bf16.msra.mxu0 %v3388_v50 }
 0x15c   : > { %3026 = vmatprep.subr.bf16.mxu0 %v3389_v51  ;;  %v3403_v51 = vld [vmem:[#allocation3 + $0x160] sm:$0xff]  }
 0x15f   : > { %3027 = vmatpush3.bf16.msra.mxu0 %v3391_v53  ;;  %v3402_v53 = vld [vmem:[#allocation3 + $0x10] sm:$0xff]  }
 0x160   : > { %3028 = vmatprep.subr.bf16.mxu0 %v3392_v54  ;;  %v3404_v54 = vld [vmem:[#allocation3 + $0x120] sm:$0xff]  }
 0x208   : > { %v401_v56 = vpop.f32.mrb[0].mxu1 }
 0x209   : > { %v360_v57 = vpop.f32.mrb[0].mxu0  ;;  %v3220_v58 = vpop.f32.mrb[1].mxu1 }
 0x20a   : > { %v362_v59 = vpop.f32.mrb[1].mxu0  ;;  %v404_v60 = vpop.f32.mrb[2].mxu1  ;;  %v3629_v58 = vmov 1966171168  }
 0x20b   : > { %v364_v61 = vpop.f32.mrb[2].mxu0  ;;  %v3221_v62 = vpop.f32.mrb[3].mxu1  ;;  %v672_v60 = vlaneseq }
 0x20c   : > { %v365_v63 = vpop.f32.mrb[3].mxu0 }
 0x20d   : > { %vm3837_vm9 = vcmp.lt.s32.totalorder %v672_v60, 288 }
 0x210   : > { %v494_v0 = vpop.f32.mrb[4].mxu1 }
 0x211   : > { %v495_v1 = vadd.f32 %v494_v0, %v401_v56  ;;  %v453_v2 = vpop.f32.mrb[4].mxu0  ;;  %v3228_v3 = vpop.f32.mrb[5].mxu1  ;;  %v3395_v56 = vld [vmem:[#allocation3 + $0x40] sm:$0xff]   ;;  %v673_v0 = vshrl.u32 %v672_v60, 7  ;;  %v3408_v60 = vld [vmem:[#allocation3 + $0x128] sm:$0xff]  }
 0x212   : > { %v454_v4 = vadd.f32 %v453_v2, %v360_v57  ;;  %v455_v6 = vpop.f32.mrb[5].mxu0  ;;  %v497_v7 = vpop.f32.mrb[6].mxu1  ;;  %v3394_v57 = vld [vmem:[#allocation3 + $0xc8] sm:$0xff]   ;;  %3039 = vmatprep.subr.bf16.mxu1 %v3395_v56  ;;  %v3405_v56 = vld [vmem:[#allocation3 + $0x58] sm:$0xff]  }
 0x213   : > { %v456_v8 = vadd.f32 %v455_v6, %v362_v59  ;;  %v457_v9 = vpop.f32.mrb[6].mxu0  ;;  %v3229_v10 = vpop.f32.mrb[7].mxu1  ;;  %3029 = vmatpush3.bf16.msra.mxu0 %v3394_v57  ;;  %v670_v59 = vunpack.c.l.s4 %v3629_v58  ;;  %v3857_v30 = vsub.s32 2, %v673_v0  ;;  %v3859_v31 = vsub.s32 1, %v673_v0  ;;  %v3407_v57 = vld [vmem:[#allocation3 + $0x168] sm:$0xff]  }
 0x214   : > { %v458_v11 = vpop.f32.mrb[7].mxu0  ;;  %3246 = vmatprep.subr.bf16.mxu0 %v3622_v5 }
 0x215   : > { %v671_v63 = vunpack.c.0.s8 %v670_v59  ;;  %v3406_v59 = vld [vmem:[#allocation3 + $0x18] sm:$0xff]  }
 0x217   : > { %v674_v7 = vsub.s32 %v671_v63, %v673_v0  ;;  %v3410_v63 = vld [vmem:[#allocation3 + $0x20] sm:$0xff]  }
 0x218   : > { %v609_v12 = vpop.f32.mrb[8].mxu1 }
 0x219   : > { %v617_v14 = vadd.f32 %v609_v12, %v495_v1  ;;  %v568_v15 = vpop.f32.mrb[8].mxu0  ;;  %v3236_v16 = vpop.f32.mrb[9].mxu1 }
 0x21a   : > { %v615_v17 = vadd.f32 %v568_v15, %v454_v4  ;;  %v570_v18 = vpop.f32.mrb[9].mxu0  ;;  %v612_v19 = vpop.f32.mrb[10].mxu1 }
 0x21b   : > { %v616_v20 = vadd.f32 %v570_v18, %v456_v8  ;;  %v620_v21 = vadd.f32 %v617_v14, %v243_v13  ;;  %v572_v22 = vpop.f32.mrb[10].mxu0  ;;  %v3237_v23 = vpop.f32.mrb[11].mxu1 }
 0x21c   : > { %v618_v24 = vadd.f32 %v615_v17, %v243_v13  ;;  %v573_v25 = vpop.f32.mrb[11].mxu0 }
 0x21d   : > { %v623_v26 = vmax.f32 %v620_v21, 0.0  ;;  %v619_v27 = vadd.f32 %v616_v20, %v243_v13 }
 0x21e   : > { %v621_v28 = vmax.f32 %v618_v24, 0.0 }
 0x21f   : > { %631 = vrot.lane.b32.xlu0 %v623_v26, %s3620_s30  ;;  %v622_v32 = vmax.f32 %v619_v27, 0.0 }
 0x220   : > { %627 = vrot.lane.b32.xlu1 %v621_v28, %s3620_s30 }
 0x224   : > { %629 = vrot.lane.b32.xlu1 %v622_v32, %s3620_s30 }
 0x291   : > { %v632_v39 = vpop.permute.xlu0 %631 }
 0x292   : > { %v628_v36 = vpop.permute.xlu1 %627  ;;  %v639_v47 = vsel %vm638_vm7, %v632_v39, 0.0 }
 0x293   : > { %v642_v49 = vmax.f32 %v623_v26, %v639_v47 }
 0x296   : > { %v630_v40 = vpop.permute.xlu1 %629 }
 0x297   : > { %v633_v41 = vsel %vm257_vm0, %v628_v36, %v630_v40  ;;  %v634_v42 = vsel %vm257_vm0, %v630_v40, %v632_v39  ;;  %v3396_v39 = vld [vmem:[#allocation3] sm:$0xff]  }
 0x298   : > { %v640_v44 = vmax.f32 %v621_v28, %v633_v41  ;;  %v641_v45 = vmax.f32 %v622_v32, %v634_v42  ;;  %v3861_v32 = vsub.s32 0, %v673_v0  ;;  %v3412_v0 = vld [vmem:[#allocation3 + $0x130] sm:$0xff]  }
 0x29a   : > { %648 = vrot.lane.b32.xlu0 %v641_v45, %s3624_s12  ;;  %646 = vrot.lane.b32.xlu1 %v640_v44, %s3624_s12 }
 0x29e   : > { %650 = vrot.lane.b32.xlu1 %v642_v49, %s3624_s12  ;;  %s3960_s12 = scalar_lea.hbm %s4007_s5, %s3002_s10 }
 0x30c   : > { %v649_v61 = vpop.permute.xlu0 %648  ;;  %v647_v62 = vpop.permute.xlu1 %646 }
 0x30d   : > { %v653_v1 = vsel %vm304_vm3, %v647_v62, %v649_v61  ;;  %v3411_v62 = vld [vmem:[#allocation3 + $0x170] sm:$0xff]  }
 0x30e   : > { %v660_v6 = vmax.f32 %v640_v44, %v653_v1  ;;  %v3397_v44 = vld [vmem:[#allocation3 + $0x80] sm:$0xff]   ;;  %v3413_v1 = vld [vmem:[#allocation3 + $0x68] sm:$0xff]  }
 0x310   : > { %v651_v2 = vpop.permute.xlu1 %650 }
 0x311   : > { %v654_v3 = vsel %vm304_vm3, %v649_v61, %v651_v2  ;;  %v659_v4 = vsel %vm658_vm8, %v651_v2, 0.0  ;;  %v3409_v61 = vld [vmem:[#allocation3 + $0x60] sm:$0xff]   ;;  %v3415_v2 = vld [vmem:[#allocation3 + $0x178] sm:$0xff]  }
 0x312   : > { %v661_v8 = vmax.f32 %v641_v45, %v654_v3  ;;  %v662_v9 = vmax.f32 %v642_v49, %v659_v4  ;;  %v3398_v45 = vld [vmem:[#allocation3 + $0x48] sm:$0xff]   ;;  %v3401_v49 = vld [vmem:[#allocation3 + $0x50] sm:$0xff]   ;;  %v3416_v4 = vld [vmem:[#allocation3 + $0x138] sm:$0xff]  }
 0x313   : > { %v3414_v3 = vld [vmem:[#allocation3 + $0x28] sm:$0xff]  }
 0x314   : > { %v666_v10 = vcombine.low %v660_v6, %v661_v8  ;;  %v667_v11 = vcombine.high %v660_v6, %v661_v8  ;;  %v668_v12 = vcombine.high %v662_v9, %v662_v9  ;;  %v689_v15 = vrot.slane %v662_v9, %v674_v7  ;;  %v3417_v6 = vld [vmem:[#allocation3 + $0x70] sm:$0xff]   ;;  %v3420_v9 = vld [vmem:[#allocation3 + $0x140] sm:$0xff]  }
 0x315   : > { %v3418_v8 = vld [vmem:[#allocation3 + $0x30] sm:$0xff]  }
 0x316   : > { %v675_v13 = vrot.slane %v666_v10, %v674_v7  ;;  %v682_v14 = vrot.slane %v667_v11, %v674_v7  ;;  %v696_v16 = vrot.slane %v668_v12, %v674_v7  ;;  %v3421_v10 = vld [vmem:[#allocation3 + $0x78] sm:$0xff]   ;;  %v3423_v11 = vld [vmem:[#allocation3 + $0x188] sm:$0xff]  }
 0x317   : > { %v3422_v12 = vld [vmem:[#allocation3 + $0x38] sm:$0xff]  }
 0x318   : > { %v697_v17 = vcombine.low %v675_v13, %v689_v15  ;;  %v698_v18 = vcombine.high %v675_v13, %v689_v15  ;;  %v699_v19 = vcombine.low %v682_v14, %v696_v16  ;;  %v700_v20 = vcombine.high %v682_v14, %v696_v16  ;;  %v3424_v13 = vld [vmem:[#allocation3 + $0x148] sm:$0xff]   ;;  %v3425_v15 = vld [vmem:[#allocation3 + $0x190] sm:$0xff]   ;;  %v3426_v16 = vld [vmem:[#allocation3 + $0x1a0] sm:$0xff]  }
 0x31a   : > { %v707_v22 = vrot.slane %v697_v17, %v674_v7  ;;  %v714_v23 = vrot.slane %v699_v19, %v674_v7  ;;  %v721_v24 = vrot.slane %v698_v18, %v674_v7  ;;  %v728_v25 = vrot.slane %v700_v20, %v674_v7  ;;  %v3419_v7 = vld [vmem:[#allocation3 + $0x180] sm:$0xff]   ;;  %v3427_v18 = vld [vmem:[#allocation3 + $0x150] sm:$0xff]   ;;  %v3428_v19 = vld [vmem:[#allocation3 + $0x198] sm:$0xff]  }
 0x31b   : > { %v3429_v20 = vld [vmem:[#allocation3 + $0x1a8] sm:$0xff]  }
 0x31c   : > { %v729_v26 = vcombine.high %v707_v22, %v707_v22  ;;  %v730_v27 = vcombine.high %v714_v23, %v714_v23  ;;  %v731_v28 = vcombine.high %v721_v24, %v721_v24  ;;  %v732_v29 = vcombine.high %v728_v25, %v728_v25  ;;  %745 = vst.msk [vmem:[#allocation2] sm:$0x7] %vm3837_vm9, %v707_v22 }
 0x31d   : > { %746 = vst.msk [vmem:[#allocation2 + $0x3] sm:$0x7] %vm3837_vm9, %v721_v24  ;;  %749 = vst.msk [vmem:[#allocation2 + $0xc] sm:$0x7] %vm3837_vm9, %v714_v23  ;;  %v3430_v23 = vld [vmem:[#allocation3 + $0x158] sm:$0xff]   ;;  %v3431_v24 = vld [vmem:[#allocation3 + $0x1f0] sm:$0xff]  }
 0x31e   : > { %750 = vst.msk [vmem:[#allocation2 + $0xf] sm:$0x7] %vm3837_vm9, %v728_v25  ;;  %747 = vst.msk [vmem:[#allocation2 + $0x6] sm:$0x7] %vm3837_vm9, %v729_v26 }
 0x31f   : > { %748 = vst.msk [vmem:[#allocation2 + $0x9] sm:$0x7] %vm3837_vm9, %v731_v28  ;;  %751 = vst.msk [vmem:[#allocation2 + $0x12] sm:$0x7] %vm3837_vm9, %v730_v27  ;;  %v3432_v27 = vld [vmem:[#allocation3 + $0x1b0] sm:$0xff]  }
 0x320   : > { %752 = vst.msk [vmem:[#allocation2 + $0x15] sm:$0x7] %vm3837_vm9, %v732_v29  ;;  %v3433_v29 = vld [vmem:[#allocation3 + $0x230] sm:$0xff]  }
 0x323   : > { %v3863_v34 = vld [vmem:[#allocation2] sm:$0x7] }
 0x324   : > { %v810_v33 = vld [vmem:[#allocation2 + $0x3] sm:$0x7]  ;;  %v762_v38 = vrot.slane %v3863_v34, %v3859_v31  ;;  %v766_v50 = vrot.slane %v3863_v34, %v3857_v30  ;;  %v758_v14 = vrot.slane %v3863_v34, %v3861_v32  ;;  %v3434_v34 = vld [vmem:[#allocation3 + $0x1f8] sm:$0xff]  }
 0x325   : > { %v819_v35 = vrot.slane %v810_v33, %v3859_v31  ;;  %v823_v36 = vrot.slane %v810_v33, %v3857_v30  ;;  %v815_v37 = vrot.slane %v810_v33, %v3861_v32  ;;  %v3871_v47 = vld [vmem:[#allocation2 + $0x6] sm:$0x7] }
 0x326   : > { %v771_v43 = vpack.c.bf16 %v762_v38, %v762_v38  ;;  %v1260_v52 = vrot.slane %v3871_v47, %v3859_v31  ;;  %v772_v55 = vpack.c.bf16 %v766_v50, %v766_v50  ;;  %v770_v17 = vpack.c.bf16 %v758_v14, %v758_v14  ;;  %v3886_v21 = vld [vmem:[#allocation2 + $0x9] sm:$0x7]  ;;  %v3436_v38 = vld [vmem:[#allocation3 + $0x238] sm:$0xff]   ;;  %v3444_v50 = vld [vmem:[#allocation3 + $0x248] sm:$0xff]  }
 0x327   : > { %v828_v40 = vpack.c.bf16 %v819_v35, %v819_v35  ;;  %v829_v41 = vpack.c.bf16 %v823_v36, %v823_v36  ;;  %v827_v42 = vpack.c.bf16 %v815_v37, %v815_v37  ;;  %v1264_v22 = vrot.slane %v3871_v47, %v3857_v30  ;;  %v3435_v36 = vld [vmem:[#allocation3 + $0x1b8] sm:$0xff]   ;;  %v3897_v37 = vld [vmem:[#allocation2 + $0xc] sm:$0x7] }
 0x328   : > { %v1269_v58 = vpack.c.bf16 %v1260_v52, %v1260_v52  ;;  %v1256_v25 = vrot.slane %v3871_v47, %v3861_v32  ;;  %v1510_v26 = vrot.slane %v3886_v21, %v3859_v31  ;;  %v3443_v47 = vld [vmem:[#allocation3 + $0x288] sm:$0xff]   ;;  %v3447_v52 = vld [vmem:[#allocation3 + $0x290] sm:$0xff]  }
 0x329   : > { %1011 = vmatprep.mubr.bf16.mxu0 %v828_v40  ;;  %3243 = vmatmul.mubr.msk.bf16.vlgmr.msra.gmra.mrb[12].mxu1 %vm975_vm10, %v829_v41  ;;  %v1270_v28 = vpack.c.bf16 %v1264_v22, %v1264_v22  ;;  %v1514_v40 = vrot.slane %v3886_v21, %v3857_v30  ;;  %v3439_v41 = vld [vmem:[#allocation3 + $0x280] sm:$0xff]   ;;  %v3467_v14 = vld [vmem:[#allocation3 + $0x310] sm:$0xff]  }
 0x32a   : > { %3040 = vmatpush3.bf16.msra.mxu1 %v3396_v39  ;;  %1012 = vmatmul.mubr.bf16.vlgmr.msra.gmra.mrb[12].mxu0 %v827_v42  ;;  %v1268_v33 = vpack.c.bf16 %v1256_v25, %v1256_v25  ;;  %v1519_v35 = vpack.c.bf16 %v1510_v26, %v1510_v26  ;;  %v3437_v39 = vld [vmem:[#allocation3 + $0x200] sm:$0xff]   ;;  %v1760_v42 = vrot.slane %v3897_v37, %v3859_v31  ;;  %v3472_v25 = vld [vmem:[#allocation3 + $0x358] sm:$0xff]  }
 0x32b   : > { %1202 = vmatprep.mubr.bf16.mxu1 %v771_v43  ;;  %3247 = vmatpush3.bf16.msra.mxu0 %v3397_v44  ;;  %v3438_v43 = vld [vmem:[#allocation3 + $0x1c0] sm:$0xff]  }
 0x32c   : > { %3041 = vmatprep.subr.bf16.mxu1 %v3398_v45  ;;  %3248 = vmatprep.subr.bf16.mxu0 %v3622_v5  ;;  %v3440_v44 = vld [vmem:[#allocation3 + $0x240] sm:$0xff]   ;;  %v1520_v45 = vpack.c.bf16 %v1514_v40, %v1514_v40  ;;  %v3480_v40 = vld [vmem:[#allocation3 + $0x368] sm:$0xff]  }
 0x32d   : > { %3250 = vmatprep.mubr.msk.bf16.mxu0 %vm3623_vm2, %v3622_v5  ;;  %v3473_v26 = vld [vmem:[#allocation3 + $0x320] sm:$0xff]  }
 0x32e   : > { %3042 = vmatpush3.bf16.msra.mxu1 %v3399_v46  ;;  %v3441_v46 = vld [vmem:[#allocation3 + $0x208] sm:$0xff]  }
 0x32f   : > { %3249 = vmatpush3.bf16.msra.mxu0 %v3400_v48  ;;  %3043 = vmatprep.subr.bf16.mxu1 %v3401_v49  ;;  %v1769_v48 = vpack.c.bf16 %v1760_v42, %v1760_v42  ;;  %v3442_v49 = vld [vmem:[#allocation3 + $0x1c8] sm:$0xff]   ;;  %v3483_v42 = vld [vmem:[#allocation3 + $0x3b0] sm:$0xff]  }
 0x330   : > { %3064 = vmatprep.subr.bf16.mxu0 %v3403_v51  ;;  %v3445_v51 = vld [vmem:[#allocation3 + $0x210] sm:$0xff]  }
 0x332   : > { %3044 = vmatpush3.bf16.msra.mxu1 %v3402_v53  ;;  %3251 = vmatmul.mubr.msk.bf16.vlgmr.msra.gmra.mrb[16].mxu0 %vm975_vm10, %v772_v55  ;;  %v3446_v53 = vld [vmem:[#allocation3 + $0x1d0] sm:$0xff]   ;;  %v3449_v55 = vld [vmem:[#allocation3 + $0x218] sm:$0xff]  }
 0x333   : > { %3065 = vmatpush3.bf16.msra.mxu0 %v3404_v54  ;;  %1451 = vmatprep.mubr.bf16.mxu0 %v1269_v58  ;;  %v3448_v54 = vld [vmem:[#allocation3 + $0x250] sm:$0xff]   ;;  %v3452_v58 = vld [vmem:[#allocation3 + $0x258] sm:$0xff]  }
 0x334   : > { %3045 = vmatprep.subr.bf16.mxu1 %v3405_v56  ;;  %3066 = vmatprep.subr.bf16.mxu0 %v3407_v57  ;;  %v3451_v56 = vld [vmem:[#allocation3 + $0x298] sm:$0xff]  }
 0x335   : > { %v3450_v57 = vld [vmem:[#allocation3 + $0x1d8] sm:$0xff]  }
 0x336   : > { %3046 = vmatpush3.bf16.msra.mxu1 %v3406_v59  ;;  %v3453_v59 = vld [vmem:[#allocation3 + $0x220] sm:$0xff]  }
 0x337   : > { %3067 = vmatpush3.bf16.msra.mxu0 %v3408_v60  ;;  %3047 = vmatprep.subr.bf16.mxu1 %v3409_v61  ;;  %v3455_v60 = vld [vmem:[#allocation3 + $0x2a0] sm:$0xff]  }
 0x338   : > { %3068 = vmatprep.subr.bf16.mxu0 %v3411_v62  ;;  %v3454_v61 = vld [vmem:[#allocation3 + $0x1e0] sm:$0xff]  }
 0x339   : > { %v3456_v62 = vld [vmem:[#allocation3 + $0x260] sm:$0xff]  }
 0x33a   : > { %3048 = vmatpush3.bf16.msra.mxu1 %v3410_v63  ;;  %v3457_v63 = vld [vmem:[#allocation3 + $0x228] sm:$0xff]  }
 0x33b   : > { %3069 = vmatpush3.bf16.msra.mxu0 %v3412_v0  ;;  %3049 = vmatprep.subr.bf16.mxu1 %v3413_v1  ;;  %v3459_v0 = vld [vmem:[#allocation3 + $0x2a8] sm:$0xff]  }
 0x33c   : > { %3070 = vmatprep.subr.bf16.mxu0 %v3415_v2  ;;  %v3458_v1 = vld [vmem:[#allocation3 + $0x1e8] sm:$0xff]  }
 0x33d   : > { %v3460_v2 = vld [vmem:[#allocation3 + $0x268] sm:$0xff]  }
 0x33e   : > { %3050 = vmatpush3.bf16.msra.mxu1 %v3414_v3  ;;  %v1506_v3 = vrot.slane %v3886_v21, %v3861_v32  ;;  %v3470_v21 = vld [vmem:[#allocation3 + $0x318] sm:$0xff]  }
 0x33f   : > { %3071 = vmatpush3.bf16.msra.mxu0 %v3416_v4  ;;  %3051 = vmatprep.subr.bf16.mxu1 %v3417_v6  ;;  %v3461_v4 = vld [vmem:[#allocation3 + $0x2b0] sm:$0xff]   ;;  %v3462_v6 = vld [vmem:[#allocation3 + $0x2c0] sm:$0xff]  }
 0x340   : > { %3072 = vmatprep.subr.bf16.mxu0 %v3419_v7  ;;  %v1518_v7 = vpack.c.bf16 %v1506_v3, %v1506_v3  ;;  %v3503_v3 = vld [vmem:[#allocation3 + $0x430] sm:$0xff]  }
 0x342   : > { %3052 = vmatpush3.bf16.msra.mxu1 %v3418_v8  ;;  %v3463_v8 = vld [vmem:[#allocation3 + $0x270] sm:$0xff]  }
 0x343   : > { %3073 = vmatpush3.bf16.msra.mxu0 %v3420_v9  ;;  %3053 = vmatprep.subr.bf16.mxu1 %v3421_v10  ;;  %v3464_v9 = vld [vmem:[#allocation3 + $0x2b8] sm:$0xff]   ;;  %v3465_v10 = vld [vmem:[#allocation3 + $0x2c8] sm:$0xff]  }
 0x344   : > { %3074 = vmatprep.subr.bf16.mxu0 %v3423_v11  ;;  %v3912_v11 = vld [vmem:[#allocation2 + $0xf] sm:$0x7] }
 0x346   : > { %3054 = vmatpush3.bf16.msra.mxu1 %v3422_v12  ;;  %v1764_v12 = vrot.slane %v3897_v37, %v3857_v30 }
 0x347   : > { %3075 = vmatpush3.bf16.msra.mxu0 %v3424_v13  ;;  %3254 = vmatprep.subr.bf16.mxu1 %v3622_v5  ;;  %v3466_v13 = vld [vmem:[#allocation3 + $0x278] sm:$0xff]  }
 0x348   : > { %3076 = vmatprep.subr.bf16.mxu0 %v3425_v15  ;;  %v1756_v15 = vrot.slane %v3897_v37, %v3861_v32  ;;  %v3479_v37 = vld [vmem:[#allocation3 + $0x3a8] sm:$0xff]  }
 0x349   : > { %1203 = vmatmul.mubr.bf16.vlgmr.msra.gmra.mrb[16].mxu1 %v770_v17  ;;  %v3468_v17 = vld [vmem:[#allocation3 + $0x2d0] sm:$0xff]  }
 0x34a   : > { %3255 = vmatpush3.bf16.msra.mxu1 %v3426_v16  ;;  %3258 = vmatprep.mubr.msk.bf16.mxu1 %vm3623_vm2, %v3622_v5  ;;  %v2010_v16 = vrot.slane %v3912_v11, %v3859_v31 }
 0x34b   : > { %3077 = vmatpush3.bf16.msra.mxu0 %v3427_v18  ;;  %3256 = vmatprep.subr.bf16.mxu1 %v3622_v5  ;;  %v1770_v18 = vpack.c.bf16 %v1764_v12, %v1764_v12 }
 0x34c   : > { %3078 = vmatprep.subr.bf16.mxu0 %v3428_v19  ;;  %v3469_v19 = vld [vmem:[#allocation3 + $0x350] sm:$0xff]   ;;  %v2019_v22 = vpack.c.bf16 %v2010_v16, %v2010_v16  ;;  %v3510_v16 = vld [vmem:[#allocation3 + $0x400] sm:$0xff]  }
 0x34e   : > { %3257 = vmatpush3.bf16.msra.mxu1 %v3429_v20  ;;  %v1768_v20 = vpack.c.bf16 %v1756_v15, %v1756_v15 }
 0x34f   : > { %3079 = vmatpush3.bf16.msra.mxu0 %v3430_v23  ;;  %3089 = vmatprep.subr.bf16.mxu1 %v3431_v24  ;;  %v3471_v23 = vld [vmem:[#allocation3 + $0x2d8] sm:$0xff]  }
 0x350   : > { %3262 = vmatprep.subr.bf16.mxu0 %v3622_v5  ;;  %v3923_v24 = vld [vmem:[#allocation2 + $0x12] sm:$0x7] }
 0x351   : > { %3259 = vmatmul.mubr.msk.bf16.vlgmr.msra.gmra.mrb[20].mxu1 %vm975_vm10, %v1270_v28  ;;  %v3475_v28 = vld [vmem:[#allocation3 + $0x3a0] sm:$0xff]  }
 0x352   : > { %1452 = vmatmul.mubr.bf16.vlgmr.msra.gmra.mrb[20].mxu0 %v1268_v33  ;;  %3090 = vmatpush3.bf16.msra.mxu1 %v3432_v27  ;;  %v2014_v27 = vrot.slane %v3912_v11, %v3857_v30  ;;  %v3474_v33 = vld [vmem:[#allocation3 + $0x2e0] sm:$0xff]  }
 0x353   : > { %1701 = vmatprep.mubr.bf16.mxu1 %v1519_v35  ;;  %3263 = vmatpush3.bf16.msra.mxu0 %v3433_v29  ;;  %v2260_v29 = vrot.slane %v3923_v24, %v3859_v31 }
 0x354   : > { %3091 = vmatprep.subr.bf16.mxu1 %v3434_v34  ;;  %3264 = vmatprep.subr.bf16.mxu0 %v3622_v5  ;;  %v3476_v34 = vld [vmem:[#allocation3 + $0x360] sm:$0xff]   ;;  %v2020_v35 = vpack.c.bf16 %v2014_v27, %v2014_v27 }
 0x355   : > { %3266 = vmatprep.mubr.msk.bf16.mxu0 %vm3623_vm2, %v3622_v5 }
 0x356   : > { %3092 = vmatpush3.bf16.msra.mxu1 %v3435_v36  ;;  %v3477_v36 = vld [vmem:[#allocation3 + $0x328] sm:$0xff]  }
 0x357   : > { %3265 = vmatpush3.bf16.msra.mxu0 %v3436_v38  ;;  %3093 = vmatprep.subr.bf16.mxu1 %v3437_v39  ;;  %v2269_v38 = vpack.c.bf16 %v2260_v29, %v2260_v29  ;;  %v3478_v39 = vld [vmem:[#allocation3 + $0x2e8] sm:$0xff]  }
 0x358   : > { %3114 = vmatprep.subr.bf16.mxu0 %v3439_v41  ;;  %v3481_v41 = vld [vmem:[#allocation3 + $0x330] sm:$0xff]  }
 0x35a   : > { %3094 = vmatpush3.bf16.msra.mxu1 %v3438_v43  ;;  %3267 = vmatmul.mubr.msk.bf16.vlgmr.msra.gmra.mrb[24].mxu0 %vm975_vm10, %v1520_v45  ;;  %v3482_v43 = vld [vmem:[#allocation3 + $0x2f0] sm:$0xff]   ;;  %v3485_v45 = vld [vmem:[#allocation3 + $0x338] sm:$0xff]  }
 0x35b   : > { %3115 = vmatpush3.bf16.msra.mxu0 %v3440_v44  ;;  %1951 = vmatprep.mubr.bf16.mxu0 %v1769_v48  ;;  %v3484_v44 = vld [vmem:[#allocation3 + $0x370] sm:$0xff]   ;;  %v3488_v48 = vld [vmem:[#allocation3 + $0x378] sm:$0xff]  }
 0x35c   : > { %3095 = vmatprep.subr.bf16.mxu1 %v3441_v46  ;;  %3116 = vmatprep.subr.bf16.mxu0 %v3443_v47  ;;  %v3487_v46 = vld [vmem:[#allocation3 + $0x3b8] sm:$0xff]  }
 0x35d   : > { %v3486_v47 = vld [vmem:[#allocation3 + $0x2f8] sm:$0xff]  }
 0x35e   : > { %3096 = vmatpush3.bf16.msra.mxu1 %v3442_v49  ;;  %v3489_v49 = vld [vmem:[#allocation3 + $0x340] sm:$0xff]  }
 0x35f   : > { %3117 = vmatpush3.bf16.msra.mxu0 %v3444_v50  ;;  %3097 = vmatprep.subr.bf16.mxu1 %v3445_v51  ;;  %v3491_v50 = vld [vmem:[#allocation3 + $0x3c0] sm:$0xff]  }
 0x360   : > { %3118 = vmatprep.subr.bf16.mxu0 %v3447_v52  ;;  %v3490_v51 = vld [vmem:[#allocation3 + $0x300] sm:$0xff]  }
 0x361   : > { %v3492_v52 = vld [vmem:[#allocation3 + $0x380] sm:$0xff]  }
 0x362   : > { %3098 = vmatpush3.bf16.msra.mxu1 %v3446_v53  ;;  %v3493_v53 = vld [vmem:[#allocation3 + $0x348] sm:$0xff]  }
 0x363   : > { %3119 = vmatpush3.bf16.msra.mxu0 %v3448_v54  ;;  %3099 = vmatprep.subr.bf16.mxu1 %v3449_v55  ;;  %v3495_v54 = vld [vmem:[#allocation3 + $0x3c8] sm:$0xff]  }
 0x364   : > { %3120 = vmatprep.subr.bf16.mxu0 %v3451_v56  ;;  %v3494_v55 = vld [vmem:[#allocation3 + $0x308] sm:$0xff]  }
 0x365   : > { %v3496_v56 = vld [vmem:[#allocation3 + $0x388] sm:$0xff]  }
 0x366   : > { %3100 = vmatpush3.bf16.msra.mxu1 %v3450_v57  ;;  %v2006_v57 = vrot.slane %v3912_v11, %v3861_v32  ;;  %v3506_v11 = vld [vmem:[#allocation3 + $0x438] sm:$0xff]  }
 0x367   : > { %3121 = vmatpush3.bf16.msra.mxu0 %v3452_v58  ;;  %3101 = vmatprep.subr.bf16.mxu1 %v3453_v59  ;;  %v3497_v58 = vld [vmem:[#allocation3 + $0x3d0] sm:$0xff]   ;;  %v3498_v59 = vld [vmem:[#allocation3 + $0x3e0] sm:$0xff]  }
 0x368   : > { %3122 = vmatprep.subr.bf16.mxu0 %v3455_v60  ;;  %v2018_v60 = vpack.c.bf16 %v2006_v57, %v2006_v57 }
 0x36a   : > { %3102 = vmatpush3.bf16.msra.mxu1 %v3454_v61  ;;  %v3499_v61 = vld [vmem:[#allocation3 + $0x390] sm:$0xff]  }
 0x36b   : > { %3123 = vmatpush3.bf16.msra.mxu0 %v3456_v62  ;;  %3103 = vmatprep.subr.bf16.mxu1 %v3457_v63  ;;  %v3500_v62 = vld [vmem:[#allocation3 + $0x3d8] sm:$0xff]   ;;  %v3501_v63 = vld [vmem:[#allocation3 + $0x3e8] sm:$0xff]  }
 0x36c   : > { %3124 = vmatprep.subr.bf16.mxu0 %v3459_v0  ;;  %v2501_v0 = vld [vmem:[#allocation2 + $0x15] sm:$0x7] }
 0x36d   : > { %v2514_v15 = vrot.slane %v2501_v0, %v3857_v30 }
 0x36e   : > { %3104 = vmatpush3.bf16.msra.mxu1 %v3458_v1  ;;  %v2264_v1 = vrot.slane %v3923_v24, %v3857_v30  ;;  %v3514_v30 = vld [vmem:[#allocation3 + $0x410] sm:$0xff]  }
 0x36f   : > { %3125 = vmatpush3.bf16.msra.mxu0 %v3460_v2  ;;  %3270 = vmatprep.subr.bf16.mxu1 %v3622_v5  ;;  %v3502_v2 = vld [vmem:[#allocation3 + $0x398] sm:$0xff]  }
 0x370   : > { %3126 = vmatprep.subr.bf16.mxu0 %v3461_v4  ;;  %v2256_v4 = vrot.slane %v3923_v24, %v3861_v32  ;;  %v3519_v24 = vld [vmem:[#allocation3 + $0x468] sm:$0xff]  }
 0x371   : > { %1702 = vmatmul.mubr.bf16.vlgmr.msra.gmra.mrb[24].mxu1 %v1518_v7  ;;  %v3504_v7 = vld [vmem:[#allocation3 + $0x3f0] sm:$0xff]  }
 0x372   : > { %3271 = vmatpush3.bf16.msra.mxu1 %v3462_v6  ;;  %3274 = vmatprep.mubr.msk.bf16.mxu1 %vm3623_vm2, %v3622_v5  ;;  %v2510_v6 = vrot.slane %v2501_v0, %v3859_v31  ;;  %v3509_v31 = vld [vmem:[#allocation3 + $0x440] sm:$0xff]  }
 0x373   : > { %3127 = vmatpush3.bf16.msra.mxu0 %v3463_v8  ;;  %3272 = vmatprep.subr.bf16.mxu1 %v3622_v5  ;;  %v2270_v8 = vpack.c.bf16 %v2264_v1, %v2264_v1 }
 0x374   : > { %3128 = vmatprep.subr.bf16.mxu0 %v3464_v9  ;;  %v3505_v9 = vld [vmem:[#allocation3 + $0x470] sm:$0xff]   ;;  %v2519_v12 = vpack.c.bf16 %v2510_v6, %v2510_v6 }
 0x376   : > { %3273 = vmatpush3.bf16.msra.mxu1 %v3465_v10  ;;  %v2268_v10 = vpack.c.bf16 %v2256_v4, %v2256_v4 }
 0x377   : > { %3129 = vmatpush3.bf16.msra.mxu0 %v3466_v13  ;;  %3139 = vmatprep.subr.bf16.mxu1 %v3467_v14  ;;  %v3507_v13 = vld [vmem:[#allocation3 + $0x3f8] sm:$0xff]  }
 0x378   : > { %3278 = vmatprep.subr.bf16.mxu0 %v3622_v5  ;;  %v3508_v14 = vld [vmem:[#allocation3 + $0x478] sm:$0xff]  }
 0x379   : > { %3275 = vmatmul.mubr.msk.bf16.vlgmr.msra.gmra.mrb[28].mxu1 %vm975_vm10, %v1770_v18  ;;  %v2520_v18 = vpack.c.bf16 %v2514_v15, %v2514_v15 }
 0x37a   : > { %1952 = vmatmul.mubr.bf16.vlgmr.msra.gmra.mrb[28].mxu0 %v1768_v20  ;;  %3140 = vmatpush3.bf16.msra.mxu1 %v3468_v17  ;;  %v3511_v17 = vld [vmem:[#allocation3 + $0x448] sm:$0xff]   ;;  %v3513_v20 = vld [vmem:[#allocation3 + $0x450] sm:$0xff]  }
 0x37b   : > { %2201 = vmatprep.mubr.bf16.mxu1 %v2019_v22  ;;  %3279 = vmatpush3.bf16.msra.mxu0 %v3469_v19  ;;  %v3512_v19 = vld [vmem:[#allocation3 + $0x408] sm:$0xff]   ;;  %v3516_v22 = vld [vmem:[#allocation3 + $0x418] sm:$0xff]  }
 0x37c   : > { %3141 = vmatprep.subr.bf16.mxu1 %v3470_v21  ;;  %3280 = vmatprep.subr.bf16.mxu0 %v3622_v5  ;;  %v3515_v21 = vld [vmem:[#allocation3 + $0x458] sm:$0xff]  }
 0x37d   : > { %3282 = vmatprep.mubr.msk.bf16.mxu0 %vm3623_vm2, %v3622_v5 }
 0x37e   : > { %3142 = vmatpush3.bf16.msra.mxu1 %v3471_v23  ;;  %v3518_v23 = vld [vmem:[#allocation3 + $0x420] sm:$0xff]  }
 0x37f   : > { %3281 = vmatpush3.bf16.msra.mxu0 %v3472_v25  ;;  %3143 = vmatprep.subr.bf16.mxu1 %v3473_v26  ;;  %v3520_v25 = vld [vmem:[#allocation3 + $0x428] sm:$0xff]   ;;  %v2506_v26 = vrot.slane %v2501_v0, %v3861_v32 }
 0x380   : > { %3164 = vmatprep.subr.bf16.mxu0 %v3475_v28 }
 0x381   : > { %v2518_v27 = vpack.c.bf16 %v2506_v26, %v2506_v26 }
 0x382   : > { %3144 = vmatpush3.bf16.msra.mxu1 %v3474_v33  ;;  %3283 = vmatmul.mubr.msk.bf16.vlgmr.msra.gmra.mrb[32].mxu0 %vm975_vm10, %v2020_v35 }
 0x383   : > { %3165 = vmatpush3.bf16.msra.mxu0 %v3476_v34  ;;  %2451 = vmatprep.mubr.bf16.mxu0 %v2269_v38 }
 0x384   : > { %3145 = vmatprep.subr.bf16.mxu1 %v3477_v36  ;;  %3166 = vmatprep.subr.bf16.mxu0 %v3479_v37 }
 0x386   : > { %3146 = vmatpush3.bf16.msra.mxu1 %v3478_v39 }
 0x387   : > { %3167 = vmatpush3.bf16.msra.mxu0 %v3480_v40  ;;  %3147 = vmatprep.subr.bf16.mxu1 %v3481_v41 }
 0x388   : > { %3168 = vmatprep.subr.bf16.mxu0 %v3483_v42 }
 0x38a   : > { %3148 = vmatpush3.bf16.msra.mxu1 %v3482_v43 }
 0x38b   : > { %3169 = vmatpush3.bf16.msra.mxu0 %v3484_v44  ;;  %3149 = vmatprep.subr.bf16.mxu1 %v3485_v45 }
 0x38c   : > { %3170 = vmatprep.subr.bf16.mxu0 %v3487_v46 }
 0x38e   : > { %3150 = vmatpush3.bf16.msra.mxu1 %v3486_v47 }
 0x38f   : > { %3171 = vmatpush3.bf16.msra.mxu0 %v3488_v48  ;;  %3151 = vmatprep.subr.bf16.mxu1 %v3489_v49 }
 0x390   : > { %3172 = vmatprep.subr.bf16.mxu0 %v3491_v50 }
 0x392   : > { %3152 = vmatpush3.bf16.msra.mxu1 %v3490_v51 }
 0x393   : > { %3173 = vmatpush3.bf16.msra.mxu0 %v3492_v52  ;;  %3153 = vmatprep.subr.bf16.mxu1 %v3493_v53 }
 0x394   : > { %3174 = vmatprep.subr.bf16.mxu0 %v3495_v54 }
 0x396   : > { %3154 = vmatpush3.bf16.msra.mxu1 %v3494_v55 }
 0x397   : > { %3175 = vmatpush3.bf16.msra.mxu0 %v3496_v56  ;;  %3286 = vmatprep.subr.bf16.mxu1 %v3622_v5 }
 0x398   : > { %3176 = vmatprep.subr.bf16.mxu0 %v3497_v58 }
 0x399   : > { %2202 = vmatmul.mubr.bf16.vlgmr.msra.gmra.mrb[32].mxu1 %v2018_v60 }
 0x39a   : > { %3287 = vmatpush3.bf16.msra.mxu1 %v3498_v59  ;;  %3290 = vmatprep.mubr.msk.bf16.mxu1 %vm3623_vm2, %v3622_v5 }
 0x39b   : > { %3177 = vmatpush3.bf16.msra.mxu0 %v3499_v61  ;;  %3288 = vmatprep.subr.bf16.mxu1 %v3622_v5 }
 0x39c   : > { %3178 = vmatprep.subr.bf16.mxu0 %v3500_v62 }
 0x39e   : > { %3289 = vmatpush3.bf16.msra.mxu1 %v3501_v63 }
 0x39f   : > { %3179 = vmatpush3.bf16.msra.mxu0 %v3502_v2  ;;  %3189 = vmatprep.subr.bf16.mxu1 %v3503_v3 }
 0x3a0   : > { %3294 = vmatprep.subr.bf16.mxu0 %v3622_v5 }
 0x3a1   : > { %3291 = vmatmul.mubr.msk.bf16.vlgmr.msra.gmra.mrb[36].mxu1 %vm975_vm10, %v2270_v8 }
 0x3a2   : > { %2452 = vmatmul.mubr.bf16.vlgmr.msra.gmra.mrb[36].mxu0 %v2268_v10  ;;  %3190 = vmatpush3.bf16.msra.mxu1 %v3504_v7 }
 0x3a3   : > { %2701 = vmatprep.mubr.bf16.mxu1 %v2519_v12  ;;  %3295 = vmatpush3.bf16.msra.mxu0 %v3505_v9 }
 0x3a4   : > { %3191 = vmatprep.subr.bf16.mxu1 %v3506_v11  ;;  %3296 = vmatprep.subr.bf16.mxu0 %v3622_v5 }
 0x3a5   : > { %3298 = vmatprep.mubr.msk.bf16.mxu0 %vm3623_vm2, %v3622_v5  ;;  %v3517_v5 = vld [vmem:[#allocation3 + $0x460] sm:$0xff]  }
 0x3a6   : > { %3192 = vmatpush3.bf16.msra.mxu1 %v3507_v13 }
 0x3a7   : > { %3297 = vmatpush3.bf16.msra.mxu0 %v3508_v14  ;;  %3193 = vmatprep.subr.bf16.mxu1 %v3509_v31 }
 0x3aa   : > { %3194 = vmatpush3.bf16.msra.mxu1 %v3510_v16  ;;  %3299 = vmatmul.mubr.msk.bf16.vlgmr.msra.gmra.mrb[40].mxu0 %vm975_vm10, %v2520_v18 }
 0x3ab   : > { %3195 = vmatprep.subr.bf16.mxu1 %v3511_v17 }
 0x3ae   : > { %3196 = vmatpush3.bf16.msra.mxu1 %v3512_v19 }
 0x3af   : > { %3197 = vmatprep.subr.bf16.mxu1 %v3513_v20 }
 0x3b2   : > { %3198 = vmatpush3.bf16.msra.mxu1 %v3514_v30 }
 0x3b3   : > { %3199 = vmatprep.subr.bf16.mxu1 %v3515_v21 }
 0x3b6   : > { %3200 = vmatpush3.bf16.msra.mxu1 %v3516_v22 }
 0x3b7   : > { %3201 = vmatprep.subr.bf16.mxu1 %v3517_v5 }
 0x3ba   : > { %3202 = vmatpush3.bf16.msra.mxu1 %v3518_v23 }
 0x3bb   : > { %3203 = vmatprep.subr.bf16.mxu1 %v3519_v24 }
 0x3be   : > { %3204 = vmatpush3.bf16.msra.mxu1 %v3520_v25 }
 0x3c1   : > { %2702 = vmatmul.mubr.bf16.vlgmr.msra.gmra.mrb[40].mxu1 %v2518_v27 }
 0x3fc   : > { %v1053_v28 = vpop.f32.mrb[12].mxu1 }
 0x3fd   : > { %v3030_v29 = vpop.f32.mrb[12].mxu0  ;;  %v3244_v33 = vpop.f32.mrb[13].mxu1 }
 0x3fe   : > { %v3031_v34 = vpop.f32.mrb[13].mxu0  ;;  %v1056_v35 = vpop.f32.mrb[14].mxu1 }
 0x3ff   : > { %v3032_v36 = vadd.f32 %v3031_v34, %v3030_v29  ;;  %v3033_v37 = vpop.f32.mrb[14].mxu0  ;;  %v3245_v38 = vpop.f32.mrb[15].mxu1 }
 0x400   : > { %v3034_v39 = vpop.f32.mrb[15].mxu0 }
 0x401   : > { %v1054_v40 = vadd.f32 %v3032_v36, %v1053_v28 }
 0x405   : > { %v1244_v41 = vpop.f32.mrb[16].mxu0 }
 0x406   : > { %v3252_v42 = vpop.f32.mrb[17].mxu0 }
 0x407   : > { %v1247_v43 = vpop.f32.mrb[18].mxu0 }
 0x408   : > { %v3253_v44 = vpop.f32.mrb[19].mxu0 }
 0x41c   : > { %v3055_v45 = vpop.f32.mrb[16].mxu1 }
 0x41d   : > { %v3056_v46 = vpop.f32.mrb[17].mxu1 }
 0x41e   : > { %v3057_v32 = vadd.f32 %v3056_v46, %v3055_v45  ;;  %v3058_v47 = vpop.f32.mrb[18].mxu1 }
 0x41f   : > { %v3059_v48 = vpop.f32.mrb[19].mxu1 }
 0x420   : > { %v1205_v49 = vadd.f32 %v3057_v32, %v1054_v40 }
 0x422   : > { %v1245_v50 = vadd.f32 %v1244_v41, %v1205_v49 }
 0x424   : > { %v1493_v51 = vpop.f32.mrb[20].mxu1 }
 0x425   : > { %v3080_v52 = vpop.f32.mrb[20].mxu0  ;;  %v3260_v53 = vpop.f32.mrb[21].mxu1 }
 0x426   : > { %v3081_v54 = vpop.f32.mrb[21].mxu0  ;;  %v1496_v55 = vpop.f32.mrb[22].mxu1 }
 0x427   : > { %v3082_v56 = vadd.f32 %v3081_v54, %v3080_v52  ;;  %v3083_v57 = vpop.f32.mrb[22].mxu0  ;;  %v3261_v58 = vpop.f32.mrb[23].mxu1  ;;  %v2750_v52 = vld [vmem:[%s4006_s4] sm:$0x1] }
 0x428   : > { %v3084_v59 = vpop.f32.mrb[23].mxu0 }
 0x429   : > { %v1494_v60 = vadd.f32 %v3082_v56, %v1493_v51 }
 0x42b   : > { %v1499_v61 = vadd.f32 %v1494_v60, %v1245_v50 }
 0x42d   : > { %v1743_v62 = vpop.f32.mrb[24].mxu0 }
 0x42e   : > { %v3268_v63 = vpop.f32.mrb[25].mxu0 }
 0x42f   : > { %v1746_v0 = vpop.f32.mrb[26].mxu0 }
 0x430   : > { %v3269_v1 = vpop.f32.mrb[27].mxu0 }
 0x444   : > { %v3105_v2 = vpop.f32.mrb[24].mxu1 }
 0x445   : > { %v3106_v3 = vpop.f32.mrb[25].mxu1 }
 0x446   : > { %v3107_v4 = vadd.f32 %v3106_v3, %v3105_v2  ;;  %v3108_v6 = vpop.f32.mrb[26].mxu1 }
 0x447   : > { %v3109_v7 = vpop.f32.mrb[27].mxu1 }
 0x448   : > { %v1744_v8 = vadd.f32 %v3107_v4, %v1743_v62 }
 0x44a   : > { %v1749_v9 = vadd.f32 %v1744_v8, %v1499_v61 }
 0x44c   : > { %v1993_v10 = vpop.f32.mrb[28].mxu1 }
 0x44d   : > { %v3130_v11 = vpop.f32.mrb[28].mxu0  ;;  %v3276_v12 = vpop.f32.mrb[29].mxu1 }
 0x44e   : > { %v3131_v13 = vpop.f32.mrb[29].mxu0  ;;  %v1996_v14 = vpop.f32.mrb[30].mxu1 }
 0x44f   : > { %v3132_v31 = vadd.f32 %v3131_v13, %v3130_v11  ;;  %v3133_v15 = vpop.f32.mrb[30].mxu0  ;;  %v3277_v16 = vpop.f32.mrb[31].mxu1 }
 0x450   : > { %v3134_v17 = vpop.f32.mrb[31].mxu0 }
 0x451   : > { %v1994_v18 = vadd.f32 %v3132_v31, %v1993_v10 }
 0x453   : > { %v1999_v19 = vadd.f32 %v1994_v18, %v1749_v9 }
 0x455   : > { %v2243_v20 = vpop.f32.mrb[32].mxu0 }
 0x456   : > { %v3284_v30 = vpop.f32.mrb[33].mxu0 }
 0x457   : > { %v2246_v21 = vpop.f32.mrb[34].mxu0 }
 0x458   : > { %v3285_v22 = vpop.f32.mrb[35].mxu0 }
 0x46c   : > { %v3155_v5 = vpop.f32.mrb[32].mxu1 }
 0x46d   : > { %v3156_v23 = vpop.f32.mrb[33].mxu1 }
 0x46e   : > { %v3157_v24 = vadd.f32 %v3156_v23, %v3155_v5  ;;  %v3158_v25 = vpop.f32.mrb[34].mxu1 }
 0x46f   : > { %v3159_v26 = vpop.f32.mrb[35].mxu1 }
 0x470   : > { %v2244_v27 = vadd.f32 %v3157_v24, %v2243_v20 }
 0x472   : > { %v2249_v28 = vadd.f32 %v2244_v27, %v1999_v19 }
 0x474   : > { %v2493_v29 = vpop.f32.mrb[36].mxu1 }
 0x475   : > { %v3180_v33 = vpop.f32.mrb[36].mxu0  ;;  %v3292_v34 = vpop.f32.mrb[37].mxu1 }
 0x476   : > { %v3181_v35 = vpop.f32.mrb[37].mxu0  ;;  %v2496_v36 = vpop.f32.mrb[38].mxu1 }
 0x477   : > { %v3182_v37 = vadd.f32 %v3181_v35, %v3180_v33  ;;  %v3183_v38 = vpop.f32.mrb[38].mxu0  ;;  %v3293_v39 = vpop.f32.mrb[39].mxu1 }
 0x478   : > { %v3184_v40 = vpop.f32.mrb[39].mxu0 }
 0x479   : > { %v2494_v41 = vadd.f32 %v3182_v37, %v2493_v29 }
 0x47b   : > { %v2499_v42 = vadd.f32 %v2494_v41, %v2249_v28 }
 0x47d   : > { %v2743_v43 = vpop.f32.mrb[40].mxu0 }
 0x47e   : > { %v3300_v44 = vpop.f32.mrb[41].mxu0 }
 0x47f   : > { %v2746_v45 = vpop.f32.mrb[42].mxu0 }
 0x480   : > { %v3301_v46 = vpop.f32.mrb[43].mxu0 }
 0x494   : > { %v3205_v32 = vpop.f32.mrb[40].mxu1 }
 0x495   : > { %v3206_v47 = vpop.f32.mrb[41].mxu1 }
 0x496   : > { %v3207_v48 = vadd.f32 %v3206_v47, %v3205_v32  ;;  %v3208_v49 = vpop.f32.mrb[42].mxu1 }
 0x497   : > { %v3209_v50 = vpop.f32.mrb[43].mxu1 }
 0x498   : > { %v2744_v51 = vadd.f32 %v3207_v48, %v2743_v43 }
 0x49a   : > { %v2749_v53 = vadd.f32 %v2744_v51, %v2499_v42 }
 0x49c   : > { %v2751_v54 = vadd.f32 %v2750_v52, %v2749_v53 }
 0x49e   : > { %2752 = vst [vmem:[%s231_s8] sm:$0x1] %v2751_v54 }
 0x49f   : > { %3562 = shalt.err (!%p3559_p7)
}
 0x4a0   : > { %s3563_s17 = scalar_lea.hbm %s3960_s12, 16  ;;  %s3567_s26 = scalar_lea.hbm %s4007_s5, 32 }
 0x4a1   : > { %p3564_p8 = scmp.ne.s32.totalorder %s3960_s12, %s3563_s17  ;;  %p3568_p1 = scmp.lt.u32.totalorder %s3960_s12, %s4007_s5 }
 0x4a2   : > { %p3569_p0 = scmp.lt.u32.totalorder %s3567_s26, %s3563_s17  ;;  %p3571_p6 = scmp.lt.u32.totalorder %s3563_s17, %s3960_s12 }
 0x4a3   : > { %p3565_p11 = pnand %p3564_p8, %p4020_p9 }
 0x4a4   : > { %p3570_p5 = por %p3569_p0, %p3568_p1 }
 0x4a5   : > { %p3566_p13 = pneg %p3565_p11 }
 0x4a6   : > { %p3572_p10 = por %p3571_p6, %p3570_p5 }
 0x4a8   : > { %p3573_p12 = pnand %p3572_p10, %p3566_p13 }
 0x4aa   : > { %3576 = shalt.err (!%p3573_p12)
}
 0x4ab   : > { %3307 = dma.vmem_to_hbm [thread:$0]  (%p4020_p9), %s3962_s11, 16, %s3960_s12, %s2754_s13  }
 0x4ac PF: > { %p3319_p2 = scmp.ge.s32.totalorder %s3615_s21, 2  ;;  %s2778_s10 = sand.u32 1, %s3603_s18  }
 0x4ad   : > { %p4021_p3 = scmp.ne.s32.totalorder %s4012_s29, 0  ;;  %s2779_s8 = scalar_lea.sflag [#allocation5], %s2778_s10 }
 0x4af   : > { %p3314_p4 = pnand %p3319_p2, %p4021_p3 }
 0x4b1   : > { %3598 = dma.done.wait (!%p3314_p4), %s2779_s8, 16  }
 0x4b2   : > { %3600 = vsyncadd (!%p3314_p4), %s2779_s8, 4294967280  ;;  %p16_p7 = scmp.ge.s32.totalorder %s3686_s24, 4   ;;  %s4022_s18 = smov %s3607_s19 }
 0x4b3   : > { %s4023_s19 = smov %s3611_s20  ;;  %s4024_s20 = smov %s3697_s27 }
 0x4b4   : > { %s4025_s21 = smov %s3686_s24  ;;  %18 = sbr.rel (!%p16_p7) target bundleno = 4 (0x4), region = 94 }
 0x4bb   :  { %2783 = vsyncpa [#allocation4], 1 }
 0x4bc   :  { %2785 = vsyncpa [#allocation4 + $0x1], 1 }
 0x4bd   :  { %2786 = vsyncpa [#allocation5], 1 }
 0x4be   :  { %2788 = vsyncpa [#allocation5 + $0x1], 1 }

</bundles_post_ra>
